<compile_context>
chip_gen: v5e
topology: v5e:2x2
jax: 0.10.0
libtpu: 0.0.40
codegen_flags: <defaults>
</compile_context>

<pallas_src>
import functools

import jax
import jax.numpy as jnp
from jax.experimental import pallas as pl
from jax.experimental.pallas import tpu as pltpu


# ------------------------------ fused kernel --------------------------------

def _fused_kernel(x_ref, w1_ref, w2_ref, w3_ref, wf1_ref, vec_ref, o_ref,
                  *, LC1, LC2, LC3, H):
    """Whole ConvElm forward for one batch tile.

    x_ref   : (Bt, L*Cin)        position-major flattened input
    w1..w3  : (L*Cin_prev, L*Cout) block-banded 'same'-conv matrices
    wf1_ref : (L*C3, H)          fc1 weight (flatten permutation pre-folded)
    vec_ref : (8, 512) packed row vectors:
              row 0: conv1 bias tiled (LC1), row 1: conv2 bias tiled (LC2),
              row 2: conv3 bias tiled (LC3), row 3: fc1 bias (H), row 4: fc2^T (H)
    o_ref   : (Bt, 1)
    """
    f32 = jnp.float32
    x = x_ref[...].astype(f32)

    # Static, lane-aligned slices of the packed bias/fc2 slab (free).
    b1 = vec_ref[0:1, :LC1]
    b2 = vec_ref[1:2, :LC2]
    b3 = vec_ref[2:3, :LC3]
    bf1 = vec_ref[3:4, :H]
    wf2_row = vec_ref[4:5, :H]

    # conv1/conv2/conv3 (+bias, ReLU), each as ONE lane-dense MXU contraction.
    a1 = jnp.maximum(jnp.dot(x, w1_ref[...], preferred_element_type=f32) + b1, 0.0)
    a2 = jnp.maximum(jnp.dot(a1, w2_ref[...], preferred_element_type=f32) + b2, 0.0)
    a3 = jnp.maximum(jnp.dot(a2, w3_ref[...], preferred_element_type=f32) + b3, 0.0)

    # flatten + fc1 (+bias, ReLU): single (Bt, L*C3) @ (L*C3, H) contraction.
    h = jnp.maximum(jnp.dot(a3, wf1_ref[...], preferred_element_type=f32) + bf1, 0.0)

    # fc2 (no bias): a 1-wide MXU matmul would waste a full weight load; use the
    # VPU (multiply) + XLU (lane reduce) instead. Output stays 2-D (Bt, 1).
    o_ref[...] = jnp.sum(h * wf2_row, axis=-1, keepdims=True).astype(o_ref.dtype)


# --------------------- trace-time weight layout plumbing ---------------------

def _conv1d_same_as_dense(w_kio, L):
    """(K, Cin, Cout) conv1d weight -> (L*Cin, L*Cout) block-banded matrix.

    Implements 'same'-padded conv1d on a position-major flattened activation
    (index l*C + c); out-of-range taps become zero blocks (the padding)."""
    K, Cin, Cout = w_kio.shape
    left = (K - 1) // 2
    w4 = jnp.zeros((L, Cin, L, Cout), w_kio.dtype)
    for k in range(K):
        # out[lo] uses in[lo + k - left]  =>  nonzero where lo = li + (left - k)
        diag = jnp.eye(L, L, k=left - k, dtype=w_kio.dtype)
        w4 = w4 + jnp.einsum("ij,co->icjo", diag, w_kio[k])
    return w4.reshape(L * Cin, L * Cout)


# ------------------------------ JAX wrapper ----------------------------------

def conv_elm_forward(x_ncl, params, *, b_tile=128):
    """Full ConvElm.forward.  x_ncl: (B, feat_len, win_len) NCL (PyTorch layout)."""
    B, Cin, L = x_ncl.shape
    C1 = params["w1"].shape[-1]
    C2 = params["w2"].shape[-1]
    C3 = params["w3"].shape[-1]
    H = params["wf1"].shape[1]
    f32 = jnp.float32

    # --- trace-time layout plumbing (no kernel compute is hoisted) ---
    W1 = _conv1d_same_as_dense(params["w1"].astype(f32), L)   # (L*Cin, L*C1)
    W2 = _conv1d_same_as_dense(params["w2"].astype(f32), L)   # (L*C1,  L*C2)
    W3 = _conv1d_same_as_dense(params["w3"].astype(f32), L)   # (L*C2,  L*C3)

    # torch.flatten(start_dim=1) on NCL uses index c*L + l; kernel activations are
    # position-major (l*C3 + c) -> permute fc1 rows accordingly at trace time.
    wf1 = params["wf1"].astype(f32)                            # (C3*L, H)
    Wf1 = wf1.reshape(C3, L, H).transpose(1, 0, 2).reshape(L * C3, H)

    LC1, LC2, LC3 = L * C1, L * C2, L * C3
    vec_w = ((max(LC1, LC2, LC3, H) + 127) // 128) * 128       # lane-aligned width
    vecs = jnp.zeros((8, vec_w), f32)
    vecs = vecs.at[0, :LC1].set(jnp.tile(params["b1"].astype(f32), L))
    vecs = vecs.at[1, :LC2].set(jnp.tile(params["b2"].astype(f32), L))
    vecs = vecs.at[2, :LC3].set(jnp.tile(params["b3"].astype(f32), L))
    vecs = vecs.at[3, :H].set(params["bf1"].astype(f32))
    vecs = vecs.at[4, :H].set(params["wf2"].astype(f32).reshape(H))

    # Position-major flattened input: x_flat[b, l*Cin + c] = x[b, c, l].
    x_flat = jnp.transpose(x_ncl, (0, 2, 1)).reshape(B, L * Cin).astype(f32)

    bt = min(B, b_tile)
    nb = pl.cdiv(B, bt)
    Bp = nb * bt
    if Bp != B:
        x_flat = jnp.pad(x_flat, ((0, Bp - B), (0, 0)))

    kernel = functools.partial(_fused_kernel, LC1=LC1, LC2=LC2, LC3=LC3, H=H)

    out = pl.pallas_call(
        kernel,
        out_shape=jax.ShapeDtypeStruct((Bp, 1), f32),
        grid=(nb,),
        in_specs=[
            pl.BlockSpec((bt, L * Cin), lambda b: (b, 0)),
            pl.BlockSpec(W1.shape, lambda b: (0, 0)),
            pl.BlockSpec(W2.shape, lambda b: (0, 0)),
            pl.BlockSpec(W3.shape, lambda b: (0, 0)),
            pl.BlockSpec(Wf1.shape, lambda b: (0, 0)),
            pl.BlockSpec(vecs.shape, lambda b: (0, 0)),
        ],
        out_specs=pl.BlockSpec((bt, 1), lambda b: (b, 0)),
        compiler_params=pltpu.CompilerParams(
            dimension_semantics=("parallel",)),   # v7x: batch tiles across 2 TCs
    )(x_flat, W1, W2, W3, Wf1, vecs)

    return out[:B]


# --------------------------- reference (pure JAX) ---------------------------

def _ref_forward(x_ncl, params):
    def conv(x, w_kio, b, K):
        total = K - 1
        left = total // 2
        xp = jnp.pad(x, ((0, 0), (left, total - left), (0, 0)))
        L = x.shape[1]
        acc = sum(jnp.einsum("blc,co->blo", xp[:, k:k + L, :], w_kio[k])
                  for k in range(K))
        return jnp.maximum(acc + b[None, None, :], 0.0)

    x = jnp.transpose(x_ncl, (0, 2, 1))
    x = conv(x, params["w1"], params["b1"], params["k1"])
    x = conv(x, params["w2"], params["b2"], params["k2"])
    x = conv(x, params["w3"], params["b3"], params["k3"])
    B, L, C3 = x.shape
    x_flat = jnp.transpose(x, (0, 2, 1)).reshape(B, C3 * L)   # torch NCL flatten
    h = jnp.maximum(x_flat @ params["wf1"] + params["bf1"], 0.0)
    return h @ params["wf2"]


# ----------------------------------- main ------------------------------------

if __name__ == "__main__":
    # Module hyper-parameters (small, consistent with __init__):
    feat_len, win_len = 4, 16
    conv1_ch_mul, k1 = 2, 3          # conv1: feat_len -> 10*2 = 20 ch
    conv2_ch_mul, k2 = 3, 5          # conv2: 20 -> 30 ch
    conv3_ch_mul, k3 = 2, 3          # conv3: 30 -> 20 ch
    fc_mul = 1                       # fc1: 20*16=320 -> 50, fc2: 50 -> 1 (no bias)

    C1, C2, C3 = 10 * conv1_ch_mul, 10 * conv2_ch_mul, 10 * conv3_ch_mul
    flatten_width = C3 * round(win_len)
    H = 50 * fc_mul
    B = 2

    key = jax.random.PRNGKey(0)
    ks = jax.random.split(key, 10)
    params = {
        # conv weights stored as (K, Cin, Cout); PyTorch's (Cout, Cin, K) would
        # need w.transpose(2, 1, 0).  Synthetic deterministic init here.
        "w1": 0.1 * jax.random.normal(ks[0], (k1, feat_len, C1), jnp.float32),
        "b1": 0.1 * jax.random.normal(ks[1], (C1,), jnp.float32),
        "k1": k1,
        "w2": 0.1 * jax.random.normal(ks[2], (k2, C1, C2), jnp.float32),
        "b2": 0.1 * jax.random.normal(ks[3], (C2,), jnp.float32),
        "k2": k2,
        "w3": 0.1 * jax.random.normal(ks[4], (k3, C2, C3), jnp.float32),
        "b3": 0.1 * jax.random.normal(ks[5], (C3,), jnp.float32),
        "k3": k3,
        "wf1": 0.1 * jax.random.normal(ks[6], (flatten_width, H), jnp.float32),
        "bf1": 0.1 * jax.random.normal(ks[7], (H,), jnp.float32),
        "wf2": 0.1 * jax.random.normal(ks[8], (H, 1), jnp.float32),
    }

    x = jax.random.normal(ks[9], (B, feat_len, win_len), jnp.float32)  # NCL

    out = jax.block_until_ready(conv_elm_forward(x, params))
    ref = jax.block_until_ready(_ref_forward(x, params))

    assert out.shape == (B, 1)
    assert jnp.allclose(out, ref, atol=1e-4, rtol=1e-4)
    print("KERNEL_OK")
</pallas_src>

<mosaic_0001>
module attributes {stable_mosaic.version = 11 : i64} {
  func.func @_fused_kernel(%arg0: i32, %arg1: memref<2x64xf32, #tpu.memory_space<vmem>>, %arg2: memref<64x320xf32, #tpu.memory_space<vmem>>, %arg3: memref<320x480xf32, #tpu.memory_space<vmem>>, %arg4: memref<480x320xf32, #tpu.memory_space<vmem>>, %arg5: memref<320x50xf32, #tpu.memory_space<vmem>>, %arg6: memref<8x512xf32, #tpu.memory_space<vmem>>, %arg7: memref<2x1xf32, #tpu.memory_space<vmem>>) attributes {dimension_semantics = [#tpu.dimension_semantics<parallel>], iteration_bounds = array<i64: 1>, scalar_prefetch = 0 : i64, scratch_operands = 0 : i64, tpu.core_type = #tpu.core_type<tc>, window_params = [{transform_indices = @transform_0, window_bounds = array<i64: 2, 64>}, {pipeline_mode = #tpu.pipeline_mode<synchronous>, transform_indices = @transform_1, window_bounds = array<i64: 64, 320>}, {pipeline_mode = #tpu.pipeline_mode<synchronous>, transform_indices = @transform_2, window_bounds = array<i64: 320, 480>}, {pipeline_mode = #tpu.pipeline_mode<synchronous>, transform_indices = @transform_3, window_bounds = array<i64: 480, 320>}, {pipeline_mode = #tpu.pipeline_mode<synchronous>, transform_indices = @transform_4, window_bounds = array<i64: 320, 50>}, {pipeline_mode = #tpu.pipeline_mode<synchronous>, transform_indices = @transform_5, window_bounds = array<i64: 8, 512>}, {transform_indices = @transform_6, window_bounds = array<i64: 2, 1>}]} {
    %c0 = arith.constant 0 : index
    %c0_0 = arith.constant 0 : index
    %0 = vector.load %arg1[%c0, %c0_0] : memref<2x64xf32, #tpu.memory_space<vmem>>, vector<2x64xf32>
    %c0_1 = arith.constant 0 : index
    %c0_2 = arith.constant 0 : index
    %1 = vector.load %arg6[%c0_1, %c0_2] : memref<8x512xf32, #tpu.memory_space<vmem>>, vector<1x320xf32>
    %c1 = arith.constant 1 : index
    %c0_3 = arith.constant 0 : index
    %2 = vector.load %arg6[%c1, %c0_3] : memref<8x512xf32, #tpu.memory_space<vmem>>, vector<1x480xf32>
    %c2 = arith.constant 2 : index
    %c0_4 = arith.constant 0 : index
    %3 = vector.load %arg6[%c2, %c0_4] : memref<8x512xf32, #tpu.memory_space<vmem>>, vector<1x320xf32>
    %c3 = arith.constant 3 : index
    %c0_5 = arith.constant 0 : index
    %4 = vector.load %arg6[%c3, %c0_5] : memref<8x512xf32, #tpu.memory_space<vmem>>, vector<1x50xf32>
    %c4 = arith.constant 4 : index
    %c0_6 = arith.constant 0 : index
    %5 = vector.load %arg6[%c4, %c0_6] : memref<8x512xf32, #tpu.memory_space<vmem>>, vector<1x50xf32>
    %c0_7 = arith.constant 0 : index
    %c0_8 = arith.constant 0 : index
    %6 = vector.load %arg2[%c0_7, %c0_8] : memref<64x320xf32, #tpu.memory_space<vmem>>, vector<64x320xf32>
    %cst = arith.constant dense<0.000000e+00> : vector<2x320xf32>
    %7 = tpu.matmul %0, %6, %cst {dimension_numbers = #tpu.dot_dimension_numbers<[1], [0], [0], [1], [0, 0, 1, 1], [], []>} : vector<2x64xf32>, vector<64x320xf32>, vector<2x320xf32> -> vector<2x320xf32>
    %8 = vector.broadcast %1 : vector<1x320xf32> to vector<2x320xf32>
    %9 = arith.addf %7, %8 : vector<2x320xf32>
    %cst_9 = arith.constant 0.000000e+00 : f32
    %10 = vector.broadcast %cst_9 : f32 to vector<2x320xf32>
    %11 = arith.maximumf %9, %10 : vector<2x320xf32>
    %c0_10 = arith.constant 0 : index
    %c0_11 = arith.constant 0 : index
    %12 = vector.load %arg3[%c0_10, %c0_11] : memref<320x480xf32, #tpu.memory_space<vmem>>, vector<320x480xf32>
    %cst_12 = arith.constant dense<0.000000e+00> : vector<2x480xf32>
    %13 = tpu.matmul %11, %12, %cst_12 {dimension_numbers = #tpu.dot_dimension_numbers<[1], [0], [0], [1], [0, 0, 1, 1], [], []>} : vector<2x320xf32>, vector<320x480xf32>, vector<2x480xf32> -> vector<2x480xf32>
    %14 = vector.broadcast %2 : vector<1x480xf32> to vector<2x480xf32>
    %15 = arith.addf %13, %14 : vector<2x480xf32>
    %cst_13 = arith.constant 0.000000e+00 : f32
    %16 = vector.broadcast %cst_13 : f32 to vector<2x480xf32>
    %17 = arith.maximumf %15, %16 : vector<2x480xf32>
    %c0_14 = arith.constant 0 : index
    %c0_15 = arith.constant 0 : index
    %18 = vector.load %arg4[%c0_14, %c0_15] : memref<480x320xf32, #tpu.memory_space<vmem>>, vector<480x320xf32>
    %cst_16 = arith.constant dense<0.000000e+00> : vector<2x320xf32>
    %19 = tpu.matmul %17, %18, %cst_16 {dimension_numbers = #tpu.dot_dimension_numbers<[1], [0], [0], [1], [0, 0, 1, 1], [], []>} : vector<2x480xf32>, vector<480x320xf32>, vector<2x320xf32> -> vector<2x320xf32>
    %20 = vector.broadcast %3 : vector<1x320xf32> to vector<2x320xf32>
    %21 = arith.addf %19, %20 : vector<2x320xf32>
    %cst_17 = arith.constant 0.000000e+00 : f32
    %22 = vector.broadcast %cst_17 : f32 to vector<2x320xf32>
    %23 = arith.maximumf %21, %22 : vector<2x320xf32>
    %c0_18 = arith.constant 0 : index
    %c0_19 = arith.constant 0 : index
    %24 = vector.load %arg5[%c0_18, %c0_19] : memref<320x50xf32, #tpu.memory_space<vmem>>, vector<320x50xf32>
    %cst_20 = arith.constant dense<0.000000e+00> : vector<2x50xf32>
    %25 = tpu.matmul %23, %24, %cst_20 {dimension_numbers = #tpu.dot_dimension_numbers<[1], [0], [0], [1], [0, 0, 1, 1], [], []>} : vector<2x320xf32>, vector<320x50xf32>, vector<2x50xf32> -> vector<2x50xf32>
    %26 = vector.broadcast %4 : vector<1x50xf32> to vector<2x50xf32>
    %27 = arith.addf %25, %26 : vector<2x50xf32>
    %cst_21 = arith.constant 0.000000e+00 : f32
    %28 = vector.broadcast %cst_21 : f32 to vector<2x50xf32>
    %29 = arith.maximumf %27, %28 : vector<2x50xf32>
    %30 = vector.broadcast %5 : vector<1x50xf32> to vector<2x50xf32>
    %31 = arith.mulf %29, %30 : vector<2x50xf32>
    %cst_22 = arith.constant dense<0.000000e+00> : vector<2xf32>
    %32 = vector.multi_reduction <add>, %31, %cst_22 [1] : vector<2x50xf32> to vector<2xf32>
    %33 = vector.shape_cast %32 : vector<2xf32> to vector<2x1xf32>
    %c0_23 = arith.constant 0 : index
    %c0_24 = arith.constant 0 : index
    %34 = vector.load %arg7[%c0_23, %c0_24] : memref<2x1xf32, #tpu.memory_space<vmem>>, vector<2x1xf32>
    tpu.vector_store %arg7[%c0_23, %c0_24], %33 {strides = array<i32>} : memref<2x1xf32, #tpu.memory_space<vmem>>, vector<2x1xf32>,
    return
  }
  func.func @transform_0(%arg0: i32) -> (i32, i32) {
    %c0_i32 = arith.constant 0 : i32
    %c0_i32_0 = arith.constant 0 : i32
    return %arg0, %c0_i32 : i32, i32
  }
  func.func @transform_1(%arg0: i32) -> (i32, i32) {
    %c0_i32 = arith.constant 0 : i32
    %c0_i32_0 = arith.constant 0 : i32
    %c0_i32_1 = arith.constant 0 : i32
    return %c0_i32, %c0_i32_0 : i32, i32
  }
  func.func @transform_2(%arg0: i32) -> (i32, i32) {
    %c0_i32 = arith.constant 0 : i32
    %c0_i32_0 = arith.constant 0 : i32
    %c0_i32_1 = arith.constant 0 : i32
    return %c0_i32, %c0_i32_0 : i32, i32
  }
  func.func @transform_3(%arg0: i32) -> (i32, i32) {
    %c0_i32 = arith.constant 0 : i32
    %c0_i32_0 = arith.constant 0 : i32
    %c0_i32_1 = arith.constant 0 : i32
    return %c0_i32, %c0_i32_0 : i32, i32
  }
  func.func @transform_4(%arg0: i32) -> (i32, i32) {
    %c0_i32 = arith.constant 0 : i32
    %c0_i32_0 = arith.constant 0 : i32
    %c0_i32_1 = arith.constant 0 : i32
    return %c0_i32, %c0_i32_0 : i32, i32
  }
  func.func @transform_5(%arg0: i32) -> (i32, i32) {
    %c0_i32 = arith.constant 0 : i32
    %c0_i32_0 = arith.constant 0 : i32
    %c0_i32_1 = arith.constant 0 : i32
    return %c0_i32, %c0_i32_0 : i32, i32
  }
  func.func @transform_6(%arg0: i32) -> (i32, i32) {
    %c0_i32 = arith.constant 0 : i32
    %c0_i32_0 = arith.constant 0 : i32
    return %arg0, %c0_i32 : i32, i32
  }
}

</mosaic_0001>

<bundles_post_ra>
// kernel: tpu_custom_call.1
= control target key start
LH: loop header
LB: loop body
LE: loop exit
PB: predicated region body
PF: predicated region fallthrough
CT: control target
= control target key end

     0   :  { %vm62_vm0 = vcmask 523264   ;;  %vm732_vm1 = vcmask 785408   ;;  %vm1084_vm2 = vcmask 402432   ;;  %vm1088_vm3 = vcmask 1024   ;;  %s2416_s1 = inlined_call_operand.vmem [shape: f32[64,320], index: 1, kind: input, shape index: {}]   ;;  %s2417_s2 = inlined_call_operand.vmem [shape: f32[320,480], index: 2, kind: input, shape index: {}]   ;;  %s2418_s0 = inlined_call_operand.vmem [shape: f32[2,64], index: 0, kind: input, shape index: {}]   ;;  %s2419_s5 = inlined_call_operand.vmem [shape: f32[8,512], index: 5, kind: input, shape index: {}]   ;;  %s2420_s3 = inlined_call_operand.vmem [shape: f32[480,320], index: 3, kind: input, shape index: {}]   ;;  %s2421_s4 = inlined_call_operand.vmem [shape: f32[320,50], index: 4, kind: input, shape index: {}]   ;;  %s2422_s6 = inlined_call_operand.vmem [shape: f32[2,1], index: 6, kind: output, shape index: {}]  }
   0x1   :  { %v52_v0 = vld [vmem:[%s2416_s1 + $0xa8] sm:$0xff]  ;;  %v53_v1 = vld [vmem:[%s2416_s1 + $0xb0] sm:$0xff]  ;;  %v54_v2 = vld [vmem:[%s2416_s1 + $0xb8] sm:$0xff] }
   0x2   :  { %74 = vmatpush.msra.mxu3 %v52_v0  ;;  %94 = vmatpush.msra.mxu1 %v53_v1  ;;  %v49_v3 = vld [vmem:[%s2416_s1 + $0x90] sm:$0xff]  ;;  %v50_v4 = vld [vmem:[%s2416_s1 + $0x98] sm:$0xff]  ;;  %v51_v5 = vld [vmem:[%s2416_s1 + $0xa0] sm:$0xff] }
   0x3   :  { %114 = vmatpush.msra.mxu2 %v54_v2  ;;  %v46_v6 = vld [vmem:[%s2416_s1 + $0x78] sm:$0xff]  ;;  %v47_v7 = vld [vmem:[%s2416_s1 + $0x80] sm:$0xff]  ;;  %v48_v8 = vld [vmem:[%s2416_s1 + $0x88] sm:$0xff] }
   0x4   :  { %75 = vmatpush.msra.mxu3 %v49_v3  ;;  %95 = vmatpush.msra.mxu1 %v50_v4  ;;  %v43_v9 = vld [vmem:[%s2416_s1 + $0x60] sm:$0xff]  ;;  %v44_v10 = vld [vmem:[%s2416_s1 + $0x68] sm:$0xff]  ;;  %v45_v11 = vld [vmem:[%s2416_s1 + $0x70] sm:$0xff] }
   0x5   :  { %115 = vmatpush.msra.mxu2 %v51_v5  ;;  %v40_v12 = vld [vmem:[%s2416_s1 + $0x48] sm:$0xff]  ;;  %v41_v13 = vld [vmem:[%s2416_s1 + $0x50] sm:$0xff]  ;;  %v42_v14 = vld [vmem:[%s2416_s1 + $0x58] sm:$0xff] }
   0x6   :  { %76 = vmatpush.msra.mxu3 %v46_v6  ;;  %96 = vmatpush.msra.mxu1 %v47_v7  ;;  %v37_v15 = vld [vmem:[%s2416_s1 + $0x30] sm:$0xff]  ;;  %v38_v16 = vld [vmem:[%s2416_s1 + $0x38] sm:$0xff]  ;;  %v253_v17 = vld [vmem:[%s2417_s2 + $0x3e0] sm:$0xff] }
   0x7   :  { %116 = vmatpush.msra.mxu2 %v48_v8  ;;  %v39_v18 = vld [vmem:[%s2416_s1 + $0x40] sm:$0xff]  ;;  %v34_v20 = vld [vmem:[%s2416_s1 + $0x18] sm:$0xff]  ;;  %321 = vmatpush.msra.mxu0 %v253_v17  ;;  %v36_v22 = vld [vmem:[%s2416_s1 + $0x28] sm:$0xff] }
   0x8   :  { %77 = vmatpush.msra.mxu3 %v43_v9  ;;  %97 = vmatpush.msra.mxu1 %v44_v10  ;;  %v249_v19 = vld [vmem:[%s2417_s2 + $0x3c0] sm:$0xff]  ;;  %v32_v25 = vld [vmem:[%s2416_s1 + $0x8] sm:$0xff]  ;;  %v33_v26 = vld [vmem:[%s2416_s1 + $0x10] sm:$0xff] }
   0x9   :  { %117 = vmatpush.msra.mxu2 %v45_v11  ;;  %v35_v21 = vld [vmem:[%s2416_s1 + $0x20] sm:$0xff]  ;;  %322 = vmatpush.msra.mxu0 %v249_v19  ;;  %v190_v29 = vld [vmem:[%s2417_s2 + $0x1e8] sm:$0xff] }
   0xa   :  { %78 = vmatpush.msra.mxu3 %v40_v12  ;;  %98 = vmatpush.msra.mxu1 %v41_v13  ;;  %v245_v23 = vld [vmem:[%s2417_s2 + $0x3a0] sm:$0xff]  ;;  %v186_v33 = vld [vmem:[%s2417_s2 + $0x1c8] sm:$0xff] }
   0xb   :  { %118 = vmatpush.msra.mxu2 %v42_v14  ;;  %v31_v24 = vld [vmem:[%s2416_s1] sm:$0xff]  ;;  %323 = vmatpush.msra.mxu0 %v245_v23  ;;  %v182_v37 = vld [vmem:[%s2417_s2 + $0x1a8] sm:$0xff]  ;;  %v191_v14 = vld [vmem:[%s2417_s2 + $0x1f0] sm:$0xff] }
   0xc   :  { %79 = vmatpush.msra.mxu3 %v37_v15  ;;  %99 = vmatpush.msra.mxu1 %v38_v16  ;;  %v23_v27 = vld [vmem:[%s2418_s0] sm:$0x3]  ;;  %v178_v41 = vld [vmem:[%s2417_s2 + $0x188] sm:$0xff] }
   0xd   :  { %119 = vmatpush.msra.mxu2 %v39_v18  ;;  %v241_v28 = vld [vmem:[%s2417_s2 + $0x380] sm:$0xff]  ;;  %v174_v45 = vld [vmem:[%s2417_s2 + $0x168] sm:$0xff]  ;;  %v187_v18 = vld [vmem:[%s2417_s2 + $0x1d0] sm:$0xff] }
   0xe   :  { %80 = vmatpush.msra.mxu3 %v34_v20  ;;  %100 = vmatpush.msra.mxu1 %v35_v21  ;;  %v189_v30 = vld [vmem:[%s2417_s2 + $0x1e0] sm:$0xff]  ;;  %v170_v49 = vld [vmem:[%s2417_s2 + $0x148] sm:$0xff] }
   0xf   :  { %120 = vmatpush.msra.mxu2 %v36_v22  ;;  %v285_v31 = vld [vmem:[%s2417_s2 + $0x4e0] sm:$0xff]  ;;  %324 = vmatpush.msra.mxu0 %v241_v28  ;;  %v166_v53 = vld [vmem:[%s2417_s2 + $0x128] sm:$0xff]  ;;  %v183_v22 = vld [vmem:[%s2417_s2 + $0x1b0] sm:$0xff] }
  0x10   :  { %81 = vmatpush.msra.mxu3 %v31_v24  ;;  %101 = vmatpush.msra.mxu1 %v32_v25  ;;  %v237_v32 = vld [vmem:[%s2417_s2 + $0x360] sm:$0xff]  ;;  %v162_v57 = vld [vmem:[%s2417_s2 + $0x108] sm:$0xff] }
  0x11   :  { %121 = vmatpush.msra.mxu2 %v33_v26  ;;  %1096 = vmatmul.msk.f32.vlgmr.msra.gmra.mxu3 %vm62_vm0, %v23_v27  ;;  %v185_v34 = vld [vmem:[%s2417_s2 + $0x1c0] sm:$0xff]  ;;  %v158_v61 = vld [vmem:[%s2417_s2 + $0xe8] sm:$0xff]  ;;  %v179_v26 = vld [vmem:[%s2417_s2 + $0x190] sm:$0xff] }
  0x12   :  { %1097 = vmatmul.msk.f32.vlgmr.msra.gmra.mxu1 %vm62_vm0, %v23_v27  ;;  %1098 = vmatmul.msk.f32.vlgmr.msra.gmra.mxu2 %vm62_vm0, %v23_v27  ;;  %v281_v35 = vld [vmem:[%s2417_s2 + $0x4c0] sm:$0xff]  ;;  %v254_v62 = vld [vmem:[%s2417_s2 + $0x3e8] sm:$0xff]  ;;  %v255_v27 = vld [vmem:[%s2417_s2 + $0x3f0] sm:$0xff] }
  0x13   :  { %361 = vmatpush.msrb.mxu2 %v190_v29  ;;  %v233_v36 = vld [vmem:[%s2417_s2 + $0x340] sm:$0xff]  ;;  %301 = vmatpush.msrb.mxu3 %v189_v30  ;;  %v154_v1 = vld [vmem:[%s2417_s2 + $0xc8] sm:$0xff]  ;;  %v175_v30 = vld [vmem:[%s2417_s2 + $0x170] sm:$0xff] }
  0x14   :  { %349 = vmatpush.msrb.mxu1 %v285_v31  ;;  %325 = vmatpush.msra.mxu0 %v237_v32  ;;  %v181_v38 = vld [vmem:[%s2417_s2 + $0x1a0] sm:$0xff]  ;;  %v250_v2 = vld [vmem:[%s2417_s2 + $0x3c8] sm:$0xff]  ;;  %v251_v31 = vld [vmem:[%s2417_s2 + $0x3d0] sm:$0xff] }
  0x15   :  { %362 = vmatpush.msrb.mxu2 %v186_v33  ;;  %v277_v39 = vld [vmem:[%s2417_s2 + $0x4a0] sm:$0xff]  ;;  %302 = vmatpush.msrb.mxu3 %v185_v34  ;;  %v150_v5 = vld [vmem:[%s2417_s2 + $0xa8] sm:$0xff]  ;;  %v171_v34 = vld [vmem:[%s2417_s2 + $0x150] sm:$0xff] }
  0x16   :  { %v229_v40 = vld [vmem:[%s2417_s2 + $0x320] sm:$0xff]  ;;  %350 = vmatpush.msrb.mxu1 %v281_v35  ;;  %326 = vmatpush.msra.mxu0 %v233_v36  ;;  %v246_v6 = vld [vmem:[%s2417_s2 + $0x3a8] sm:$0xff]  ;;  %v247_v35 = vld [vmem:[%s2417_s2 + $0x3b0] sm:$0xff] }
  0x17   :  { %363 = vmatpush.msrb.mxu2 %v182_v37  ;;  %v177_v42 = vld [vmem:[%s2417_s2 + $0x180] sm:$0xff]  ;;  %303 = vmatpush.msrb.mxu3 %v181_v38  ;;  %v146_v9 = vld [vmem:[%s2417_s2 + $0x88] sm:$0xff]  ;;  %v167_v38 = vld [vmem:[%s2417_s2 + $0x130] sm:$0xff] }
  0x18   :  { %v273_v43 = vld [vmem:[%s2417_s2 + $0x480] sm:$0xff]  ;;  %351 = vmatpush.msrb.mxu1 %v277_v39  ;;  %327 = vmatpush.msra.mxu0 %v229_v40  ;;  %v242_v10 = vld [vmem:[%s2417_s2 + $0x388] sm:$0xff]  ;;  %v243_v39 = vld [vmem:[%s2417_s2 + $0x390] sm:$0xff] }
  0x19   :  { %v225_v44 = vld [vmem:[%s2417_s2 + $0x300] sm:$0xff]  ;;  %364 = vmatpush.msrb.mxu2 %v178_v41  ;;  %304 = vmatpush.msrb.mxu3 %v177_v42  ;;  %v142_v13 = vld [vmem:[%s2417_s2 + $0x68] sm:$0xff]  ;;  %v163_v40 = vld [vmem:[%s2417_s2 + $0x110] sm:$0xff] }
  0x1a   :  { %v173_v46 = vld [vmem:[%s2417_s2 + $0x160] sm:$0xff]  ;;  %352 = vmatpush.msrb.mxu1 %v273_v43  ;;  %328 = vmatpush.msra.mxu0 %v225_v44  ;;  %v238_v15 = vld [vmem:[%s2417_s2 + $0x368] sm:$0xff]  ;;  %v239_v41 = vld [vmem:[%s2417_s2 + $0x370] sm:$0xff] }
  0x1b   :  { %v269_v47 = vld [vmem:[%s2417_s2 + $0x460] sm:$0xff]  ;;  %365 = vmatpush.msrb.mxu2 %v174_v45  ;;  %305 = vmatpush.msrb.mxu3 %v173_v46  ;;  %v138_v16 = vld [vmem:[%s2417_s2 + $0x48] sm:$0xff]  ;;  %v159_v42 = vld [vmem:[%s2417_s2 + $0xf0] sm:$0xff] }
  0x1c   :  { %v221_v48 = vld [vmem:[%s2417_s2 + $0x2e0] sm:$0xff]  ;;  %353 = vmatpush.msrb.mxu1 %v269_v47  ;;  %v234_v19 = vld [vmem:[%s2417_s2 + $0x348] sm:$0xff]  ;;  %v235_v43 = vld [vmem:[%s2417_s2 + $0x350] sm:$0xff] }
  0x1d   :  { %v169_v50 = vld [vmem:[%s2417_s2 + $0x140] sm:$0xff]  ;;  %329 = vmatpush.msra.mxu0 %v221_v48  ;;  %366 = vmatpush.msrb.mxu2 %v170_v49  ;;  %v134_v20 = vld [vmem:[%s2417_s2 + $0x28] sm:$0xff]  ;;  %v155_v44 = vld [vmem:[%s2417_s2 + $0xd0] sm:$0xff] }
  0x1e   :  { %v265_v51 = vld [vmem:[%s2417_s2 + $0x440] sm:$0xff]  ;;  %306 = vmatpush.msrb.mxu3 %v169_v50  ;;  %v230_v23 = vld [vmem:[%s2417_s2 + $0x328] sm:$0xff]  ;;  %v151_v47 = vld [vmem:[%s2417_s2 + $0xb0] sm:$0xff] }
  0x1f   :  { %v217_v52 = vld [vmem:[%s2417_s2 + $0x2c0] sm:$0xff]  ;;  %354 = vmatpush.msrb.mxu1 %v265_v51  ;;  %367 = vmatpush.msrb.mxu2 %v166_v53  ;;  %v130_v24 = vld [vmem:[%s2417_s2 + $0x8] sm:$0xff]  ;;  %v231_v48 = vld [vmem:[%s2417_s2 + $0x330] sm:$0xff] }
  0x20   :  { %v165_v54 = vld [vmem:[%s2417_s2 + $0x120] sm:$0xff]  ;;  %330 = vmatpush.msra.mxu0 %v217_v52  ;;  %v226_v28 = vld [vmem:[%s2417_s2 + $0x308] sm:$0xff]  ;;  %v147_v51 = vld [vmem:[%s2417_s2 + $0x90] sm:$0xff] }
  0x21   :  { %v261_v55 = vld [vmem:[%s2417_s2 + $0x420] sm:$0xff]  ;;  %307 = vmatpush.msrb.mxu3 %v165_v54  ;;  %368 = vmatpush.msrb.mxu2 %v162_v57  ;;  %v222_v32 = vld [vmem:[%s2417_s2 + $0x2e8] sm:$0xff]  ;;  %v227_v52 = vld [vmem:[%s2417_s2 + $0x310] sm:$0xff] }
  0x22   :  { %v213_v56 = vld [vmem:[%s2417_s2 + $0x2a0] sm:$0xff]  ;;  %355 = vmatpush.msrb.mxu1 %v261_v55  ;;  %v286_v33 = vld [vmem:[%s2417_s2 + $0x4e8] sm:$0xff]  ;;  %v143_v55 = vld [vmem:[%s2417_s2 + $0x70] sm:$0xff] }
  0x23   :  { %v161_v58 = vld [vmem:[%s2417_s2 + $0x100] sm:$0xff]  ;;  %331 = vmatpush.msra.mxu0 %v213_v56  ;;  %369 = vmatpush.msrb.mxu2 %v158_v61  ;;  %v218_v36 = vld [vmem:[%s2417_s2 + $0x2c8] sm:$0xff]  ;;  %v223_v56 = vld [vmem:[%s2417_s2 + $0x2f0] sm:$0xff] }
  0x24   :  { %v257_v59 = vld [vmem:[%s2417_s2 + $0x400] sm:$0xff]  ;;  %308 = vmatpush.msrb.mxu3 %v161_v58  ;;  %v282_v37 = vld [vmem:[%s2417_s2 + $0x4c8] sm:$0xff] }
  0x25   :  { %v209_v60 = vld [vmem:[%s2417_s2 + $0x280] sm:$0xff]  ;;  %356 = vmatpush.msrb.mxu1 %v257_v59  ;;  %370 = vmatpush.msrb.mxu2 %v154_v1  ;;  %v214_v45 = vld [vmem:[%s2417_s2 + $0x2a8] sm:$0xff]  ;;  %v139_v59 = vld [vmem:[%s2417_s2 + $0x50] sm:$0xff] }
  0x26   :  { %v157_v63 = vld [vmem:[%s2417_s2 + $0xe0] sm:$0xff]  ;;  %332 = vmatpush.msra.mxu0 %v209_v60  ;;  %v278_v46 = vld [vmem:[%s2417_s2 + $0x4a8] sm:$0xff]  ;;  %v219_v60 = vld [vmem:[%s2417_s2 + $0x2d0] sm:$0xff] }
  0x27   :  { %v205_v0 = vld [vmem:[%s2417_s2 + $0x260] sm:$0xff]  ;;  %381 = vmatpush.msra.mxu1 %v254_v62  ;;  %309 = vmatpush.msrb.mxu3 %v157_v63  ;;  %v210_v49 = vld [vmem:[%s2417_s2 + $0x288] sm:$0xff]  ;;  %v135_v63 = vld [vmem:[%s2417_s2 + $0x30] sm:$0xff] }
  0x28   :  { %v153_v3 = vld [vmem:[%s2417_s2 + $0xc0] sm:$0xff]  ;;  %333 = vmatpush.msra.mxu0 %v205_v0  ;;  %371 = vmatpush.msrb.mxu2 %v150_v5  ;;  %v274_v50 = vld [vmem:[%s2417_s2 + $0x488] sm:$0xff]  ;;  %v215_v0 = vld [vmem:[%s2417_s2 + $0x2b0] sm:$0xff] }
  0x29   :  { %v201_v4 = vld [vmem:[%s2417_s2 + $0x240] sm:$0xff]  ;;  %382 = vmatpush.msra.mxu1 %v250_v2  ;;  %310 = vmatpush.msrb.mxu3 %v153_v3  ;;  %v206_v53 = vld [vmem:[%s2417_s2 + $0x268] sm:$0xff]  ;;  %v131_v3 = vld [vmem:[%s2417_s2 + $0x10] sm:$0xff] }
  0x2a   :  { %v149_v7 = vld [vmem:[%s2417_s2 + $0xa0] sm:$0xff]  ;;  %334 = vmatpush.msra.mxu0 %v201_v4  ;;  %372 = vmatpush.msrb.mxu2 %v146_v9  ;;  %v270_v54 = vld [vmem:[%s2417_s2 + $0x468] sm:$0xff]  ;;  %v211_v4 = vld [vmem:[%s2417_s2 + $0x290] sm:$0xff] }
  0x2b   :  { %v197_v8 = vld [vmem:[%s2417_s2 + $0x220] sm:$0xff]  ;;  %383 = vmatpush.msra.mxu1 %v246_v6  ;;  %311 = vmatpush.msrb.mxu3 %v149_v7  ;;  %v202_v57 = vld [vmem:[%s2417_s2 + $0x248] sm:$0xff]  ;;  %v207_v5 = vld [vmem:[%s2417_s2 + $0x270] sm:$0xff] }
  0x2c   :  { %v145_v11 = vld [vmem:[%s2417_s2 + $0x80] sm:$0xff]  ;;  %335 = vmatpush.msra.mxu0 %v197_v8  ;;  %373 = vmatpush.msrb.mxu2 %v142_v13  ;;  %v266_v58 = vld [vmem:[%s2417_s2 + $0x448] sm:$0xff]  ;;  %v203_v6 = vld [vmem:[%s2417_s2 + $0x250] sm:$0xff] }
  0x2d   :  { %v193_v12 = vld [vmem:[%s2417_s2 + $0x200] sm:$0xff]  ;;  %384 = vmatpush.msra.mxu1 %v242_v10  ;;  %312 = vmatpush.msrb.mxu3 %v145_v11  ;;  %v198_v61 = vld [vmem:[%s2417_s2 + $0x228] sm:$0xff]  ;;  %v199_v7 = vld [vmem:[%s2417_s2 + $0x230] sm:$0xff] }
  0x2e   :  { %v141_v17 = vld [vmem:[%s2417_s2 + $0x60] sm:$0xff]  ;;  %336 = vmatpush.msra.mxu0 %v193_v12  ;;  %374 = vmatpush.msrb.mxu2 %v138_v16  ;;  %v262_v62 = vld [vmem:[%s2417_s2 + $0x428] sm:$0xff]  ;;  %v195_v8 = vld [vmem:[%s2417_s2 + $0x210] sm:$0xff] }
  0x2f   :  { %385 = vmatpush.msra.mxu1 %v238_v15  ;;  %v137_v21 = vld [vmem:[%s2417_s2 + $0x40] sm:$0xff]  ;;  %313 = vmatpush.msrb.mxu3 %v141_v17  ;;  %v194_v1 = vld [vmem:[%s2417_s2 + $0x208] sm:$0xff]  ;;  %v288_v16 = vld [vmem:[%s2417_s2 + $0x4f8] sm:$0xff] }
  0x30   :  { %421 = vmatpush.msrb.mxu0 %v191_v14  ;;  %v133_v25 = vld [vmem:[%s2417_s2 + $0x20] sm:$0xff]  ;;  %375 = vmatpush.msrb.mxu2 %v134_v20  ;;  %v258_v2 = vld [vmem:[%s2417_s2 + $0x408] sm:$0xff] }
  0x31   :  { %386 = vmatpush.msra.mxu1 %v234_v19  ;;  %314 = vmatpush.msrb.mxu3 %v137_v21  ;;  %v129_v29 = vld [vmem:[%s2417_s2] sm:$0xff] }
  0x32   :  { %422 = vmatpush.msrb.mxu0 %v187_v18  ;;  %376 = vmatpush.msrb.mxu2 %v130_v24  ;;  %v24_v9 = vld [vmem:[%s2419_s5] ss:$8 sm:$0x7]  ;;  %v284_v18 = vld [vmem:[%s2417_s2 + $0x4d8] sm:$0xff] }
  0x33   :  { %387 = vmatpush.msra.mxu1 %v230_v23  ;;  %315 = vmatpush.msrb.mxu3 %v133_v25  ;;  %v57_v10 = vperm.slane %v24_v9, 1  ;;  %v56_v13 = vperm.slane %v24_v9, 0  ;;  %v58_v15 = vperm.slane %v24_v9, 2  ;;  %v287_v23 = vld [vmem:[%s2417_s2 + $0x4f0] sm:$0xff]  ;;  %v192_v25 = vld [vmem:[%s2417_s2 + $0x1f8] sm:$0xff] }
  0x34   :  { %423 = vmatpush.msrb.mxu0 %v183_v22  ;;  %441 = vmatpush.msra.mxu2 %v255_v27  ;;  %v283_v27 = vld [vmem:[%s2417_s2 + $0x4d0] sm:$0xff]  ;;  %v572_v9 = vld [vmem:[%s2420_s3 + $0xd8] sm:$0xff] }
  0x35   :  { %388 = vmatpush.msra.mxu1 %v226_v28  ;;  %316 = vmatpush.msrb.mxu3 %v129_v29  ;;  %v188_v28 = vld [vmem:[%s2417_s2 + $0x1d8] sm:$0xff] }
  0x36   :  { %424 = vmatpush.msrb.mxu0 %v179_v26  ;;  %442 = vmatpush.msra.mxu2 %v251_v31  ;;  %v280_v26 = vld [vmem:[%s2417_s2 + $0x4b8] sm:$0xff] }
  0x37   :  { %389 = vmatpush.msra.mxu1 %v222_v32  ;;  %409 = vmatpush.msra.mxu3 %v286_v33  ;;  %v276_v29 = vld [vmem:[%s2417_s2 + $0x498] sm:$0xff]  ;;  %v275_v33 = vld [vmem:[%s2417_s2 + $0x490] sm:$0xff] }
  0x38   :  { %425 = vmatpush.msrb.mxu0 %v175_v30  ;;  %443 = vmatpush.msra.mxu2 %v247_v35  ;;  %v279_v30 = vld [vmem:[%s2417_s2 + $0x4b0] sm:$0xff]  ;;  %v184_v31 = vld [vmem:[%s2417_s2 + $0x1b8] sm:$0xff] }
  0x39   :  { %390 = vmatpush.msra.mxu1 %v218_v36  ;;  %410 = vmatpush.msra.mxu3 %v282_v37  ;;  %v272_v32 = vld [vmem:[%s2417_s2 + $0x478] sm:$0xff]  ;;  %v271_v35 = vld [vmem:[%s2417_s2 + $0x470] sm:$0xff] }
  0x3a   :  { %426 = vmatpush.msrb.mxu0 %v171_v34  ;;  %444 = vmatpush.msra.mxu2 %v243_v39  ;;  %v180_v34 = vld [vmem:[%s2417_s2 + $0x198] sm:$0xff] }
  0x3b   :  { %391 = vmatpush.msra.mxu1 %v214_v45  ;;  %411 = vmatpush.msra.mxu3 %v278_v46  ;;  %v176_v36 = vld [vmem:[%s2417_s2 + $0x178] sm:$0xff] }
  0x3c   :  { %427 = vmatpush.msrb.mxu0 %v167_v38  ;;  %445 = vmatpush.msra.mxu2 %v239_v41  ;;  %v268_v37 = vld [vmem:[%s2417_s2 + $0x458] sm:$0xff]  ;;  %v267_v38 = vld [vmem:[%s2417_s2 + $0x450] sm:$0xff] }
  0x3d   :  { %392 = vmatpush.msra.mxu1 %v210_v49  ;;  %412 = vmatpush.msra.mxu3 %v274_v50  ;;  %v172_v39 = vld [vmem:[%s2417_s2 + $0x158] sm:$0xff]  ;;  %v263_v41 = vld [vmem:[%s2417_s2 + $0x430] sm:$0xff]  ;;  %v590_v49 = vld [vmem:[%s2420_s3 + $0x168] sm:$0xff] }
  0x3e   :  { %428 = vmatpush.msrb.mxu0 %v163_v40  ;;  %446 = vmatpush.msra.mxu2 %v235_v43  ;;  %v264_v40 = vld [vmem:[%s2417_s2 + $0x438] sm:$0xff] }
  0x3f   :  { %393 = vmatpush.msra.mxu1 %v206_v53  ;;  %413 = vmatpush.msra.mxu3 %v270_v54  ;;  %v260_v43 = vld [vmem:[%s2417_s2 + $0x418] sm:$0xff]  ;;  %v638_v53 = vld [vmem:[%s2420_s3 + $0x2e8] sm:$0xff] }
  0x40   :  { %429 = vmatpush.msrb.mxu0 %v159_v42  ;;  %447 = vmatpush.msra.mxu2 %v231_v48  ;;  %v168_v42 = vld [vmem:[%s2417_s2 + $0x138] sm:$0xff] }
  0x41   :  { %394 = vmatpush.msra.mxu1 %v202_v57  ;;  %414 = vmatpush.msra.mxu3 %v266_v58  ;;  %v164_v45 = vld [vmem:[%s2417_s2 + $0x118] sm:$0xff] }
  0x42   :  { %430 = vmatpush.msrb.mxu0 %v155_v44  ;;  %448 = vmatpush.msra.mxu2 %v227_v52  ;;  %v259_v44 = vld [vmem:[%s2417_s2 + $0x410] sm:$0xff]  ;;  %v256_v46 = vld [vmem:[%s2417_s2 + $0x3f8] sm:$0xff] }
  0x43   :  { %395 = vmatpush.msra.mxu1 %v198_v61  ;;  %415 = vmatpush.msra.mxu3 %v262_v62  ;;  %v252_v48 = vld [vmem:[%s2417_s2 + $0x3d8] sm:$0xff]  ;;  %v587_v52 = vld [vmem:[%s2420_s3 + $0x150] sm:$0xff]  ;;  %v581_v61 = vld [vmem:[%s2420_s3 + $0x120] sm:$0xff] }
  0x44   :  { %431 = vmatpush.msrb.mxu0 %v151_v47  ;;  %449 = vmatpush.msra.mxu2 %v223_v56  ;;  %v160_v47 = vld [vmem:[%s2417_s2 + $0xf8] sm:$0xff] }
  0x45   :  { %396 = vmatpush.msra.mxu1 %v194_v1  ;;  %416 = vmatpush.msra.mxu3 %v258_v2  ;;  %v156_v50 = vld [vmem:[%s2417_s2 + $0xd8] sm:$0xff]  ;;  %v578_v1 = vld [vmem:[%s2420_s3 + $0x108] sm:$0xff] }
  0x46   :  { %432 = vmatpush.msrb.mxu0 %v147_v51  ;;  %450 = vmatpush.msra.mxu2 %v219_v60  ;;  %v248_v51 = vld [vmem:[%s2417_s2 + $0x3b8] sm:$0xff] }
  0x47   :  { %v152_v54 = vld [vmem:[%s2417_s2 + $0xb8] sm:$0xff] }
  0x48   :  { %433 = vmatpush.msrb.mxu0 %v143_v55  ;;  %451 = vmatpush.msra.mxu2 %v215_v0  ;;  %v635_v55 = vld [vmem:[%s2420_s3 + $0x2d0] sm:$0xff]  ;;  %v244_v56 = vld [vmem:[%s2417_s2 + $0x398] sm:$0xff] }
  0x49   :  { %v584_v57 = vld [vmem:[%s2420_s3 + $0x138] sm:$0xff] }
  0x4a   :  { %434 = vmatpush.msrb.mxu0 %v139_v59  ;;  %452 = vmatpush.msra.mxu2 %v211_v4  ;;  %v148_v58 = vld [vmem:[%s2417_s2 + $0x98] sm:$0xff] }
  0x4b   :  { %v632_v59 = vld [vmem:[%s2420_s3 + $0x2b8] sm:$0xff] }
  0x4c   :  { %435 = vmatpush.msrb.mxu0 %v135_v63  ;;  %453 = vmatpush.msra.mxu2 %v207_v5  ;;  %v240_v60 = vld [vmem:[%s2417_s2 + $0x378] sm:$0xff]  ;;  %v629_v63 = vld [vmem:[%s2420_s3 + $0x2a0] sm:$0xff]  ;;  %v575_v5 = vld [vmem:[%s2420_s3 + $0xf0] sm:$0xff] }
  0x4d   :  { %v144_v62 = vld [vmem:[%s2417_s2 + $0x78] sm:$0xff] }
  0x4e   :  { %436 = vmatpush.msrb.mxu0 %v131_v3  ;;  %454 = vmatpush.msra.mxu2 %v203_v6  ;;  %v236_v0 = vld [vmem:[%s2417_s2 + $0x358] sm:$0xff]  ;;  %v626_v3 = vld [vmem:[%s2420_s3 + $0x288] sm:$0xff] }
  0x4f   :  { %v140_v2 = vld [vmem:[%s2417_s2 + $0x58] sm:$0xff] }
  0x50   :  { %455 = vmatpush.msra.mxu2 %v199_v7  ;;  %v232_v4 = vld [vmem:[%s2417_s2 + $0x338] sm:$0xff]  ;;  %v623_v7 = vld [vmem:[%s2420_s3 + $0x270] sm:$0xff] }
  0x51   :  { %v136_v6 = vld [vmem:[%s2417_s2 + $0x38] sm:$0xff] }
  0x52   :  { %456 = vmatpush.msra.mxu2 %v195_v8  ;;  %v228_v8 = vld [vmem:[%s2417_s2 + $0x318] sm:$0xff] }
  0x8f   :  { %v103_v11 = vpop.f32.mrf.mxu1 }
  0x90   :  { %v104_v12 = vadd.f32 %v103_v11, %v57_v10  ;;  %v132_v10 = vld [vmem:[%s2417_s2 + $0x18] sm:$0xff] }
  0x91   :  { %v620_v11 = vld [vmem:[%s2420_s3 + $0x258] sm:$0xff] }
  0x92   :  { %v1559_v14 = vmax.f32 %v104_v12, 0.0  ;;  %v224_v12 = vld [vmem:[%s2417_s2 + $0x2f8] sm:$0xff] }
  0x94   :  { %337 = vmatmul.f32.vlgmr.msra.gmra.mxu0 %v1559_v14  ;;  %v83_v17 = vpop.f32.mrf.mxu3 }
  0x95   :  { %v84_v19 = vadd.f32 %v83_v17, %v56_v13  ;;  %v123_v20 = vpop.f32.mrf.mxu2  ;;  %529 = vmatpush.msra.mxu0 %v288_v16  ;;  %v569_v13 = vld [vmem:[%s2420_s3 + $0xc0] sm:$0xff]  ;;  %v220_v16 = vld [vmem:[%s2417_s2 + $0x2d8] sm:$0xff]  ;;  %v686_v17 = vld [vmem:[%s2420_s3 + $0x468] sm:$0xff] }
  0x96   :  { %v124_v21 = vadd.f32 %v123_v20, %v58_v15  ;;  %v617_v15 = vld [vmem:[%s2420_s3 + $0x240] sm:$0xff]  ;;  %v216_v20 = vld [vmem:[%s2417_s2 + $0x2b8] sm:$0xff] }
  0x97   :  { %v1568_v22 = vmax.f32 %v84_v19, 0.0  ;;  %530 = vmatpush.msra.mxu0 %v284_v18  ;;  %v566_v18 = vld [vmem:[%s2420_s3 + $0xa8] sm:$0xff] }
  0x98   :  { %v128_v24 = vmax.f32 %v124_v21, 0.0  ;;  %v614_v19 = vld [vmem:[%s2420_s3 + $0x228] sm:$0xff]  ;;  %v683_v21 = vld [vmem:[%s2420_s3 + $0x450] sm:$0xff] }
  0x99   :  { %317 = vmatmul.f32.vlgmr.msrb.gmra.mxu3 %v1568_v22  ;;  %377 = vmatmul.f32.vlgmr.msrb.gmra.mxu2 %v1568_v22 }
  0x9a   :  { %1099 = vmatmul.msk.f32.vlgmr.msrb.gmra.mxu1 %vm62_vm0, %v128_v24  ;;  %469 = vmatpush.msrb.mxu3 %v287_v23  ;;  %v611_v23 = vld [vmem:[%s2420_s3 + $0x210] sm:$0xff] }
  0x9b   :  { %481 = vmatpush.msrb.mxu1 %v192_v25  ;;  %531 = vmatpush.msra.mxu0 %v280_v26  ;;  %v680_v25 = vld [vmem:[%s2420_s3 + $0x438] sm:$0xff] }
  0x9c   :  { %437 = vmatmul.f32.vlgmr.msrb.gmra.mxu0 %v1568_v22  ;;  %470 = vmatpush.msrb.mxu3 %v283_v27  ;;  %v560_v26 = vld [vmem:[%s2420_s3 + $0x78] sm:$0xff] }
  0x9d   :  { %482 = vmatpush.msrb.mxu1 %v188_v28  ;;  %532 = vmatpush.msra.mxu0 %v276_v29  ;;  %v608_v27 = vld [vmem:[%s2420_s3 + $0x1f8] sm:$0xff]  ;;  %v677_v29 = vld [vmem:[%s2420_s3 + $0x420] sm:$0xff] }
  0x9e   :  { %471 = vmatpush.msrb.mxu3 %v279_v30  ;;  %736 = vmatpush.msrb.mxu2 %v590_v49  ;;  %v208_v28 = vld [vmem:[%s2417_s2 + $0x278] sm:$0xff]  ;;  %v557_v30 = vld [vmem:[%s2420_s3 + $0x60] sm:$0xff] }
  0x9f   :  { %483 = vmatpush.msrb.mxu1 %v184_v31  ;;  %533 = vmatpush.msra.mxu0 %v272_v32  ;;  %v605_v31 = vld [vmem:[%s2420_s3 + $0x1e0] sm:$0xff]  ;;  %v204_v32 = vld [vmem:[%s2417_s2 + $0x258] sm:$0xff] }
  0xa0   :  { %472 = vmatpush.msrb.mxu3 %v275_v33  ;;  %737 = vmatpush.msrb.mxu2 %v587_v52  ;;  %v674_v33 = vld [vmem:[%s2420_s3 + $0x408] sm:$0xff]  ;;  %v576_v49 = vld [vmem:[%s2420_s3 + $0xf8] sm:$0xff]  ;;  %v573_v52 = vld [vmem:[%s2420_s3 + $0xe0] sm:$0xff] }
  0xa1   :  { %484 = vmatpush.msrb.mxu1 %v180_v34  ;;  %1100 = vmatmul.msk.f32.vlgmr.msra.gmra.mxu3 %vm62_vm0, %v128_v24  ;;  %v554_v34 = vld [vmem:[%s2420_s3 + $0x48] sm:$0xff] }
  0xa2   :  { %397 = vmatmul.f32.vlgmr.msra.gmra.mxu1 %v1559_v14  ;;  %457 = vmatmul.f32.vlgmr.msra.gmra.mxu2 %v1559_v14 }
  0xa3   :  { %473 = vmatpush.msrb.mxu3 %v271_v35  ;;  %485 = vmatpush.msrb.mxu1 %v176_v36  ;;  %v602_v35 = vld [vmem:[%s2420_s3 + $0x1c8] sm:$0xff]  ;;  %v200_v36 = vld [vmem:[%s2417_s2 + $0x238] sm:$0xff] }
  0xa4   :  { %534 = vmatpush.msra.mxu0 %v268_v37  ;;  %738 = vmatpush.msrb.mxu2 %v584_v57  ;;  %v671_v37 = vld [vmem:[%s2420_s3 + $0x3f0] sm:$0xff] }
  0xa5   :  { %474 = vmatpush.msrb.mxu3 %v267_v38  ;;  %486 = vmatpush.msrb.mxu1 %v172_v39  ;;  %v551_v38 = vld [vmem:[%s2420_s3 + $0x30] sm:$0xff] }
  0xa6   :  { %535 = vmatpush.msra.mxu0 %v264_v40  ;;  %739 = vmatpush.msrb.mxu2 %v581_v61  ;;  %v599_v39 = vld [vmem:[%s2420_s3 + $0x1b0] sm:$0xff]  ;;  %v196_v40 = vld [vmem:[%s2417_s2 + $0x218] sm:$0xff] }
  0xa7   :  { %475 = vmatpush.msrb.mxu3 %v263_v41  ;;  %487 = vmatpush.msrb.mxu1 %v168_v42  ;;  %v548_v41 = vld [vmem:[%s2420_s3 + $0x18] sm:$0xff]  ;;  %v659_v57 = vld [vmem:[%s2420_s3 + $0x390] sm:$0xff] }
  0xa8   :  { %536 = vmatpush.msra.mxu0 %v260_v43  ;;  %740 = vmatpush.msrb.mxu2 %v578_v1  ;;  %v596_v42 = vld [vmem:[%s2420_s3 + $0x198] sm:$0xff]  ;;  %v545_v43 = vld [vmem:[%s2420_s3] sm:$0xff]  ;;  %v675_v1 = vld [vmem:[%s2420_s3 + $0x410] sm:$0xff] }
  0xa9   :  { %476 = vmatpush.msrb.mxu3 %v259_v44  ;;  %488 = vmatpush.msrb.mxu1 %v164_v45  ;;  %v591_v44 = vld [vmem:[%s2420_s3 + $0x170] sm:$0xff]  ;;  %v588_v45 = vld [vmem:[%s2420_s3 + $0x158] sm:$0xff] }
  0xaa   :  { %1102 = vmatmul.msk.f32.vlgmr.msra.gmra.mxu0 %vm62_vm0, %v128_v24  ;;  %1101 = vmatmul.msk.f32.vlgmr.msrb.gmra.mxu3 %vm62_vm0, %v128_v24  ;;  %v212_v24 = vld [vmem:[%s2417_s2 + $0x298] sm:$0xff] }
  0xab   :  { %501 = vmatpush.msra.mxu3 %v256_v46  ;;  %489 = vmatpush.msrb.mxu1 %v160_v47  ;;  %v585_v46 = vld [vmem:[%s2420_s3 + $0x140] sm:$0xff]  ;;  %v579_v47 = vld [vmem:[%s2420_s3 + $0x110] sm:$0xff]  ;;  %v564_v61 = vld [vmem:[%s2420_s3 + $0x98] sm:$0xff] }
  0xac   :  { %756 = vmatpush.msrb.mxu0 %v638_v53  ;;  %741 = vmatpush.msrb.mxu2 %v575_v5  ;;  %v687_v53 = vld [vmem:[%s2420_s3 + $0x470] sm:$0xff]  ;;  %v672_v5 = vld [vmem:[%s2420_s3 + $0x3f8] sm:$0xff] }
  0xad   :  { %502 = vmatpush.msra.mxu3 %v252_v48  ;;  %490 = vmatpush.msrb.mxu1 %v156_v50  ;;  %v668_v48 = vld [vmem:[%s2420_s3 + $0x3d8] sm:$0xff]  ;;  %v593_v50 = vld [vmem:[%s2420_s3 + $0x180] sm:$0xff] }
  0xae   :  { %757 = vmatpush.msrb.mxu0 %v635_v55  ;;  %742 = vmatpush.msrb.mxu2 %v572_v9  ;;  %v570_v55 = vld [vmem:[%s2420_s3 + $0xc8] sm:$0xff]  ;;  %v669_v9 = vld [vmem:[%s2420_s3 + $0x3e0] sm:$0xff] }
  0xaf   :  { %503 = vmatpush.msra.mxu3 %v248_v51  ;;  %491 = vmatpush.msrb.mxu1 %v152_v54  ;;  %v665_v51 = vld [vmem:[%s2420_s3 + $0x3c0] sm:$0xff]  ;;  %v662_v54 = vld [vmem:[%s2420_s3 + $0x3a8] sm:$0xff] }
  0xb0   :  { %758 = vmatpush.msrb.mxu0 %v632_v59  ;;  %743 = vmatpush.msrb.mxu2 %v569_v13  ;;  %v681_v59 = vld [vmem:[%s2420_s3 + $0x440] sm:$0xff]  ;;  %v666_v13 = vld [vmem:[%s2420_s3 + $0x3c8] sm:$0xff] }
  0xb1   :  { %504 = vmatpush.msra.mxu3 %v244_v56  ;;  %492 = vmatpush.msrb.mxu1 %v148_v58  ;;  %v684_v56 = vld [vmem:[%s2420_s3 + $0x458] sm:$0xff]  ;;  %v567_v58 = vld [vmem:[%s2420_s3 + $0xb0] sm:$0xff] }
  0xb2   :  { %759 = vmatpush.msrb.mxu0 %v629_v63  ;;  %744 = vmatpush.msrb.mxu2 %v566_v18  ;;  %v653_v63 = vld [vmem:[%s2420_s3 + $0x360] sm:$0xff]  ;;  %v663_v18 = vld [vmem:[%s2420_s3 + $0x3b0] sm:$0xff] }
  0xb3   :  { %505 = vmatpush.msra.mxu3 %v240_v60  ;;  %493 = vmatpush.msrb.mxu1 %v144_v62  ;;  %v656_v60 = vld [vmem:[%s2420_s3 + $0x378] sm:$0xff]  ;;  %v678_v62 = vld [vmem:[%s2420_s3 + $0x428] sm:$0xff] }
  0xb4   :  { %760 = vmatpush.msrb.mxu0 %v626_v3  ;;  %v650_v3 = vld [vmem:[%s2420_s3 + $0x348] sm:$0xff] }
  0xb5   :  { %506 = vmatpush.msra.mxu3 %v236_v0  ;;  %494 = vmatpush.msrb.mxu1 %v140_v2  ;;  %v561_v0 = vld [vmem:[%s2420_s3 + $0x80] sm:$0xff]  ;;  %v722_v2 = vld [vmem:[%s2420_s3 + $0x588] sm:$0xff] }
  0xb6   :  { %761 = vmatpush.msrb.mxu0 %v623_v7  ;;  %v647_v7 = vld [vmem:[%s2420_s3 + $0x330] sm:$0xff] }
  0xb7   :  { %507 = vmatpush.msra.mxu3 %v232_v4  ;;  %495 = vmatpush.msrb.mxu1 %v136_v6  ;;  %v558_v4 = vld [vmem:[%s2420_s3 + $0x68] sm:$0xff]  ;;  %v719_v6 = vld [vmem:[%s2420_s3 + $0x570] sm:$0xff] }
  0xb8   :  { %762 = vmatpush.msrb.mxu0 %v620_v11  ;;  %v644_v11 = vld [vmem:[%s2420_s3 + $0x318] sm:$0xff] }
  0xb9   :  { %508 = vmatpush.msra.mxu3 %v228_v8  ;;  %496 = vmatpush.msrb.mxu1 %v132_v10  ;;  %v555_v8 = vld [vmem:[%s2420_s3 + $0x50] sm:$0xff]  ;;  %v716_v10 = vld [vmem:[%s2420_s3 + $0x558] sm:$0xff] }
  0xba   :  { %497 = vmatmul.f32.vlgmr.msrb.gmra.mxu1 %v1568_v22  ;;  %763 = vmatpush.msrb.mxu0 %v617_v15  ;;  %v563_v22 = vld [vmem:[%s2420_s3 + $0x90] sm:$0xff]  ;;  %v713_v15 = vld [vmem:[%s2420_s3 + $0x540] sm:$0xff] }
  0xbb   :  { %509 = vmatpush.msra.mxu3 %v224_v12  ;;  %776 = vmatpush.msra.mxu1 %v686_v17  ;;  %v552_v12 = vld [vmem:[%s2420_s3 + $0x38] sm:$0xff]  ;;  %v549_v17 = vld [vmem:[%s2420_s3 + $0x20] sm:$0xff] }
  0xbc   :  { %764 = vmatpush.msrb.mxu0 %v614_v19  ;;  %745 = vmatpush.msrb.mxu2 %v563_v22  ;;  %v710_v19 = vld [vmem:[%s2420_s3 + $0x528] sm:$0xff]  ;;  %v660_v22 = vld [vmem:[%s2420_s3 + $0x398] sm:$0xff] }
  0xbd   :  { %510 = vmatpush.msra.mxu3 %v220_v16  ;;  %777 = vmatpush.msra.mxu1 %v683_v21  ;;  %v641_v16 = vld [vmem:[%s2420_s3 + $0x300] sm:$0xff]  ;;  %v546_v21 = vld [vmem:[%s2420_s3 + $0x8] sm:$0xff] }
  0xbe   :  { %765 = vmatpush.msrb.mxu0 %v611_v23  ;;  %746 = vmatpush.msrb.mxu2 %v560_v26  ;;  %v707_v23 = vld [vmem:[%s2420_s3 + $0x510] sm:$0xff]  ;;  %v704_v26 = vld [vmem:[%s2420_s3 + $0x4f8] sm:$0xff] }
  0xbf   :  { %511 = vmatpush.msra.mxu3 %v216_v20  ;;  %778 = vmatpush.msra.mxu1 %v680_v25  ;;  %v723_v20 = vld [vmem:[%s2420_s3 + $0x590] sm:$0xff]  ;;  %v657_v25 = vld [vmem:[%s2420_s3 + $0x380] sm:$0xff] }
  0xc0   :  { %766 = vmatpush.msrb.mxu0 %v608_v27  ;;  %747 = vmatpush.msrb.mxu2 %v557_v30  ;;  %v717_v27 = vld [vmem:[%s2420_s3 + $0x560] sm:$0xff]  ;;  %v714_v30 = vld [vmem:[%s2420_s3 + $0x548] sm:$0xff] }
  0xc1   :  { %512 = vmatpush.msra.mxu3 %v212_v24  ;;  %779 = vmatpush.msra.mxu1 %v677_v29  ;;  %v720_v24 = vld [vmem:[%s2420_s3 + $0x578] sm:$0xff]  ;;  %v701_v29 = vld [vmem:[%s2420_s3 + $0x4e0] sm:$0xff] }
  0xc2   :  { %767 = vmatpush.msrb.mxu0 %v605_v31  ;;  %748 = vmatpush.msrb.mxu2 %v554_v34  ;;  %v651_v31 = vld [vmem:[%s2420_s3 + $0x350] sm:$0xff]  ;;  %v648_v34 = vld [vmem:[%s2420_s3 + $0x338] sm:$0xff] }
  0xc3   :  { %513 = vmatpush.msra.mxu3 %v208_v28  ;;  %780 = vmatpush.msra.mxu1 %v674_v33  ;;  %v654_v28 = vld [vmem:[%s2420_s3 + $0x368] sm:$0xff]  ;;  %v711_v33 = vld [vmem:[%s2420_s3 + $0x530] sm:$0xff] }
  0xc4   :  { %768 = vmatpush.msrb.mxu0 %v602_v35  ;;  %749 = vmatpush.msrb.mxu2 %v551_v38  ;;  %v695_v35 = vld [vmem:[%s2420_s3 + $0x4b0] sm:$0xff]  ;;  %v692_v38 = vld [vmem:[%s2420_s3 + $0x498] sm:$0xff] }
  0xc5   :  { %514 = vmatpush.msra.mxu3 %v204_v32  ;;  %781 = vmatpush.msra.mxu1 %v671_v37  ;;  %v698_v32 = vld [vmem:[%s2420_s3 + $0x4c8] sm:$0xff]  ;;  %v645_v37 = vld [vmem:[%s2420_s3 + $0x320] sm:$0xff] }
  0xc6   :  { %769 = vmatpush.msrb.mxu0 %v599_v39  ;;  %750 = vmatpush.msrb.mxu2 %v548_v41  ;;  %v705_v39 = vld [vmem:[%s2420_s3 + $0x500] sm:$0xff] }
  0xc7   :  { %515 = vmatpush.msra.mxu3 %v200_v36  ;;  %782 = vmatpush.msra.mxu1 %v668_v48  ;;  %v708_v36 = vld [vmem:[%s2420_s3 + $0x518] sm:$0xff]  ;;  %v689_v41 = vld [vmem:[%s2420_s3 + $0x480] sm:$0xff] }
  0xc8   :  { %770 = vmatpush.msrb.mxu0 %v596_v42  ;;  %751 = vmatpush.msrb.mxu2 %v545_v43  ;;  %v702_v42 = vld [vmem:[%s2420_s3 + $0x4e8] sm:$0xff]  ;;  %v639_v43 = vld [vmem:[%s2420_s3 + $0x2f0] sm:$0xff] }
  0xc9   :  { %516 = vmatpush.msra.mxu3 %v196_v40  ;;  %783 = vmatpush.msra.mxu1 %v665_v51  ;;  %v642_v40 = vld [vmem:[%s2420_s3 + $0x308] sm:$0xff] }
  0xca   :  { %517 = vmatmul.f32.vlgmr.msra.gmra.mxu3 %v1559_v14  ;;  %816 = vmatpush.msra.mxu2 %v591_v44  ;;  %v582_v14 = vld [vmem:[%s2420_s3 + $0x128] sm:$0xff]  ;;  %v699_v44 = vld [vmem:[%s2420_s3 + $0x4d0] sm:$0xff] }
  0xcb   :  { %771 = vmatpush.msrb.mxu0 %v593_v50  ;;  %784 = vmatpush.msra.mxu1 %v662_v54  ;;  %v2037_v48 = vld [vmem:[%s2419_s5 + $0x1] ss:$8 sm:$0xf] }
  0xcc   :  { %817 = vmatpush.msra.mxu2 %v588_v45  ;;  %800 = vmatpush.msrb.mxu3 %v722_v2  ;;  %v636_v45 = vld [vmem:[%s2420_s3 + $0x2d8] sm:$0xff]  ;;  %v630_v50 = vld [vmem:[%s2420_s3 + $0x2a8] sm:$0xff]  ;;  %v290_v51 = vperm.slane %v2037_v48, 0  ;;  %v291_v54 = vperm.slane %v2037_v48, 1  ;;  %v615_v2 = vld [vmem:[%s2420_s3 + $0x230] sm:$0xff] }
  0xcd   :  { %856 = vmatpush.msra.mxu0 %v687_v53  ;;  %785 = vmatpush.msra.mxu1 %v659_v57  ;;  %v627_v53 = vld [vmem:[%s2420_s3 + $0x290] sm:$0xff]  ;;  %v624_v57 = vld [vmem:[%s2420_s3 + $0x278] sm:$0xff] }
  0xce   :  { %818 = vmatpush.msra.mxu2 %v585_v46  ;;  %801 = vmatpush.msrb.mxu3 %v719_v6  ;;  %v696_v46 = vld [vmem:[%s2420_s3 + $0x4b8] sm:$0xff] }
  0xcf   :  { %857 = vmatpush.msra.mxu0 %v684_v56  ;;  %786 = vmatpush.msra.mxu1 %v656_v60  ;;  %v621_v60 = vld [vmem:[%s2420_s3 + $0x260] sm:$0xff] }
  0xd0   :  { %819 = vmatpush.msra.mxu2 %v582_v14  ;;  %802 = vmatpush.msrb.mxu3 %v716_v10  ;;  %v609_v10 = vld [vmem:[%s2420_s3 + $0x200] sm:$0xff] }
  0xd1   :  { %858 = vmatpush.msra.mxu0 %v681_v59  ;;  %787 = vmatpush.msra.mxu1 %v653_v63 }
  0xd2   :  { %820 = vmatpush.msra.mxu2 %v579_v47  ;;  %803 = vmatpush.msrb.mxu3 %v713_v15  ;;  %v633_v47 = vld [vmem:[%s2420_s3 + $0x2c0] sm:$0xff]  ;;  %v724_v15 = vld [vmem:[%s2420_s3 + $0x598] sm:$0xff] }
  0xd3   :  { %859 = vmatpush.msra.mxu0 %v678_v62  ;;  %788 = vmatpush.msra.mxu1 %v650_v3 }
  0xd4   :  { %821 = vmatpush.msra.mxu2 %v576_v49  ;;  %804 = vmatpush.msrb.mxu3 %v710_v19  ;;  %v693_v49 = vld [vmem:[%s2420_s3 + $0x4a0] sm:$0xff] }
  0xd5   :  { %860 = vmatpush.msra.mxu0 %v675_v1  ;;  %789 = vmatpush.msra.mxu1 %v647_v7  ;;  %v612_v7 = vld [vmem:[%s2420_s3 + $0x218] sm:$0xff]  ;;  %v721_v19 = vld [vmem:[%s2420_s3 + $0x580] sm:$0xff] }
  0xd6   :  { %822 = vmatpush.msra.mxu2 %v573_v52  ;;  %805 = vmatpush.msrb.mxu3 %v707_v23  ;;  %v690_v52 = vld [vmem:[%s2420_s3 + $0x488] sm:$0xff] }
  0xd7   :  { %861 = vmatpush.msra.mxu0 %v672_v5  ;;  %790 = vmatpush.msra.mxu1 %v644_v11  ;;  %v592_v5 = vld [vmem:[%s2420_s3 + $0x178] sm:$0xff]  ;;  %v292_v11 = vperm.slane %v2037_v48, 2  ;;  %v718_v23 = vld [vmem:[%s2420_s3 + $0x568] sm:$0xff] }
  0xd8   :  { %823 = vmatpush.msra.mxu2 %v570_v55  ;;  %806 = vmatpush.msrb.mxu3 %v704_v26  ;;  %v577_v26 = vld [vmem:[%s2420_s3 + $0x100] sm:$0xff] }
  0xd9   :  { %862 = vmatpush.msra.mxu0 %v669_v9  ;;  %791 = vmatpush.msra.mxu1 %v641_v16  ;;  %v589_v9 = vld [vmem:[%s2420_s3 + $0x160] sm:$0xff] }
  0xda   :  { %824 = vmatpush.msra.mxu2 %v567_v58  ;;  %807 = vmatpush.msrb.mxu3 %v701_v29 }
  0xdb   :  { %863 = vmatpush.msra.mxu0 %v666_v13  ;;  %880 = vmatpush.msrb.mxu1 %v723_v20  ;;  %v586_v13 = vld [vmem:[%s2420_s3 + $0x148] sm:$0xff] }
  0xdc   :  { %825 = vmatpush.msra.mxu2 %v564_v61  ;;  %808 = vmatpush.msrb.mxu3 %v698_v32  ;;  %v712_v32 = vld [vmem:[%s2420_s3 + $0x538] sm:$0xff] }
  0xdd   :  { %864 = vmatpush.msra.mxu0 %v663_v18  ;;  %881 = vmatpush.msrb.mxu1 %v720_v24  ;;  %v583_v18 = vld [vmem:[%s2420_s3 + $0x130] sm:$0xff] }
  0xde   :  { %826 = vmatpush.msra.mxu2 %v561_v0  ;;  %809 = vmatpush.msrb.mxu3 %v695_v35  ;;  %v618_v0 = vld [vmem:[%s2420_s3 + $0x248] sm:$0xff]  ;;  %v603_v24 = vld [vmem:[%s2420_s3 + $0x1d0] sm:$0xff] }
  0xdf   :  { %865 = vmatpush.msra.mxu0 %v660_v22  ;;  %882 = vmatpush.msrb.mxu1 %v717_v27  ;;  %v580_v22 = vld [vmem:[%s2420_s3 + $0x118] sm:$0xff]  ;;  %v715_v27 = vld [vmem:[%s2420_s3 + $0x550] sm:$0xff] }
  0xe0   :  { %827 = vmatpush.msra.mxu2 %v558_v4  ;;  %810 = vmatpush.msrb.mxu3 %v692_v38  ;;  %v571_v35 = vld [vmem:[%s2420_s3 + $0xd0] sm:$0xff]  ;;  %v594_v38 = vld [vmem:[%s2420_s3 + $0x188] sm:$0xff] }
  0xe1   :  { %866 = vmatpush.msra.mxu0 %v657_v25  ;;  %883 = vmatpush.msrb.mxu1 %v714_v30 }
  0xe2   :  { %828 = vmatpush.msra.mxu2 %v555_v8  ;;  %811 = vmatpush.msrb.mxu3 %v689_v41  ;;  %v706_v41 = vld [vmem:[%s2420_s3 + $0x508] sm:$0xff] }
  0xe3   :  { %867 = vmatpush.msra.mxu0 %v654_v28  ;;  %884 = vmatpush.msrb.mxu1 %v711_v33  ;;  %v600_v28 = vld [vmem:[%s2420_s3 + $0x1b8] sm:$0xff]  ;;  %v597_v33 = vld [vmem:[%s2420_s3 + $0x1a0] sm:$0xff] }
  0xe4   :  { %829 = vmatpush.msra.mxu2 %v552_v12  ;;  %836 = vmatpush.msra.mxu3 %v639_v43  ;;  %v634_v43 = vld [vmem:[%s2420_s3 + $0x2c8] sm:$0xff] }
  0xe5   :  { %868 = vmatpush.msra.mxu0 %v651_v31  ;;  %885 = vmatpush.msrb.mxu1 %v708_v36  ;;  %v574_v31 = vld [vmem:[%s2420_s3 + $0xe8] sm:$0xff]  ;;  %v640_v36 = vld [vmem:[%s2420_s3 + $0x2f8] sm:$0xff] }
  0xe6   :  { %830 = vmatpush.msra.mxu2 %v549_v17  ;;  %837 = vmatpush.msra.mxu3 %v636_v45  ;;  %v606_v17 = vld [vmem:[%s2420_s3 + $0x1e8] sm:$0xff] }
  0xe7   :  { %869 = vmatpush.msra.mxu0 %v648_v34  ;;  %886 = vmatpush.msrb.mxu1 %v705_v39  ;;  %v568_v39 = vld [vmem:[%s2420_s3 + $0xb8] sm:$0xff]  ;;  %v562_v45 = vld [vmem:[%s2420_s3 + $0x88] sm:$0xff] }
  0xe8   :  { %831 = vmatpush.msra.mxu2 %v546_v21  ;;  %838 = vmatpush.msra.mxu3 %v633_v47  ;;  %v559_v47 = vld [vmem:[%s2420_s3 + $0x70] sm:$0xff] }
  0xe9   :  { %870 = vmatpush.msra.mxu0 %v645_v37  ;;  %887 = vmatpush.msrb.mxu1 %v702_v42  ;;  %v709_v37 = vld [vmem:[%s2420_s3 + $0x520] sm:$0xff] }
  0xea   :  { %839 = vmatpush.msra.mxu3 %v630_v50  ;;  %v565_v42 = vld [vmem:[%s2420_s3 + $0xa0] sm:$0xff] }
  0xeb   :  { %871 = vmatpush.msra.mxu0 %v642_v40  ;;  %888 = vmatpush.msrb.mxu1 %v699_v44  ;;  %v637_v40 = vld [vmem:[%s2420_s3 + $0x2e0] sm:$0xff]  ;;  %v703_v44 = vld [vmem:[%s2420_s3 + $0x4f0] sm:$0xff] }
  0xec   :  { %840 = vmatpush.msra.mxu3 %v627_v53  ;;  %v697_v50 = vld [vmem:[%s2420_s3 + $0x4c0] sm:$0xff]  ;;  %v694_v53 = vld [vmem:[%s2420_s3 + $0x4a8] sm:$0xff] }
  0xed   :  { %889 = vmatpush.msrb.mxu1 %v696_v46  ;;  %v631_v46 = vld [vmem:[%s2420_s3 + $0x2b0] sm:$0xff] }
  0xee   :  { %841 = vmatpush.msra.mxu3 %v624_v57  ;;  %v550_v57 = vld [vmem:[%s2420_s3 + $0x28] sm:$0xff] }
  0xef   :  { %890 = vmatpush.msrb.mxu1 %v693_v49  ;;  %v628_v49 = vld [vmem:[%s2420_s3 + $0x298] sm:$0xff] }
  0xf0   :  { %842 = vmatpush.msra.mxu3 %v621_v60  ;;  %v616_v60 = vld [vmem:[%s2420_s3 + $0x238] sm:$0xff] }
  0xf1   :  { %891 = vmatpush.msrb.mxu1 %v690_v52  ;;  %v625_v52 = vld [vmem:[%s2420_s3 + $0x280] sm:$0xff] }
  0xf2   :  { %843 = vmatpush.msra.mxu3 %v618_v0  ;;  %v607_v0 = vld [vmem:[%s2420_s3 + $0x1f0] sm:$0xff] }
  0xf4   :  { %844 = vmatpush.msra.mxu3 %v615_v2  ;;  %v604_v2 = vld [vmem:[%s2420_s3 + $0x1d8] sm:$0xff] }
  0xf6   :  { %845 = vmatpush.msra.mxu3 %v612_v7 }
  0xf8   :  { %846 = vmatpush.msra.mxu3 %v609_v10 }
  0xfa   :  { %847 = vmatpush.msra.mxu3 %v606_v17  ;;  %v676_v17 = vld [vmem:[%s2420_s3 + $0x418] sm:$0xff] }
  0xfc   :  { %848 = vmatpush.msra.mxu3 %v603_v24  ;;  %v652_v24 = vld [vmem:[%s2420_s3 + $0x358] sm:$0xff] }
  0xfe   :  { %849 = vmatpush.msra.mxu3 %v600_v28  ;;  %v994_v28 = vld [vmem:[%s2421_s4 + $0x78] sm:$0xff] }
 0x100   :  { %850 = vmatpush.msra.mxu3 %v597_v33  ;;  %v990_v33 = vld [vmem:[%s2421_s4 + $0x58] sm:$0xff] }
 0x102   :  { %851 = vmatpush.msra.mxu3 %v594_v38  ;;  %v986_v38 = vld [vmem:[%s2421_s4 + $0x38] sm:$0xff] }
 0x111   :  { %v338_v59 = vpop.f32.mrf.mxu0 }
 0x117   :  { %v358_v14 = vpop.f32.mrf.mxu1 }
 0x119   :  { %v438_v16 = vpop.f32.mrf.mxu0 }
 0x11a   :  { %v439_v21 = vadd.f32 %v438_v16, %v292_v11  ;;  %v688_v11 = vld [vmem:[%s2420_s3 + $0x478] sm:$0xff]  ;;  %v679_v16 = vld [vmem:[%s2420_s3 + $0x430] sm:$0xff] }
 0x11c   :  { %v318_v55 = vpop.f32.mrf.mxu3  ;;  %v378_v56 = vpop.f32.mrf.mxu2 }
 0x11d   :  { %v319_v58 = vadd.f32 %v318_v55, %v290_v51  ;;  %v379_v62 = vadd.f32 %v378_v56, %v291_v54  ;;  %v556_v51 = vld [vmem:[%s2420_s3 + $0x58] sm:$0xff]  ;;  %v553_v54 = vld [vmem:[%s2420_s3 + $0x40] sm:$0xff]  ;;  %v622_v55 = vld [vmem:[%s2420_s3 + $0x268] sm:$0xff] }
 0x11e   :  { %v691_v56 = vld [vmem:[%s2420_s3 + $0x490] sm:$0xff] }
 0x11f   :  { %v339_v61 = vadd.f32 %v338_v59, %v319_v58  ;;  %v398_v63 = vpop.f32.mrf.mxu1  ;;  %v619_v58 = vld [vmem:[%s2420_s3 + $0x250] sm:$0xff] }
 0x120   :  { %v399_v4 = vadd.f32 %v398_v63, %v379_v62  ;;  %v547_v59 = vld [vmem:[%s2420_s3 + $0x10] sm:$0xff]  ;;  %v610_v62 = vld [vmem:[%s2420_s3 + $0x208] sm:$0xff]  ;;  %v293_v63 = vperm.slane %v2037_v48, 3 }
 0x121   :  { %v359_v1 = vadd.f32 %v358_v14, %v339_v61  ;;  %v700_v14 = vld [vmem:[%s2420_s3 + $0x4d8] sm:$0xff]  ;;  %v613_v61 = vld [vmem:[%s2420_s3 + $0x220] sm:$0xff]  ;;  %v598_v48 = vld [vmem:[%s2420_s3 + $0x1a8] sm:$0xff] }
 0x123   :  { %v2065_v3 = vmax.f32 %v359_v1, 0.0 }
 0x124   :  { %v418_v6 = vpop.f32.mrf.mxu3 }
 0x125   :  { %v419_v8 = vadd.f32 %v418_v6, %v399_v4  ;;  %752 = vmatmul.f32.vlgmr.msrb.gmra.mxu2 %v2065_v3  ;;  %v458_v20 = vpop.f32.mrf.mxu2 }
 0x126   :  { %896 = vmatpush.msrb.mxu2 %v592_v5  ;;  %v459_v25 = vadd.f32 %v458_v20, %v439_v21  ;;  %v667_v20 = vld [vmem:[%s2420_s3 + $0x3d0] sm:$0xff]  ;;  %v664_v21 = vld [vmem:[%s2420_s3 + $0x3b8] sm:$0xff] }
 0x127   :  { %v2081_v12 = vmax.f32 %v419_v8, 0.0  ;;  %v538_v7 = vpop.f32.mrf.mxu0 }
 0x128   :  { %897 = vmatpush.msrb.mxu2 %v589_v9  ;;  %v595_v9 = vld [vmem:[%s2420_s3 + $0x190] sm:$0xff] }
 0x129   :  { %772 = vmatmul.f32.vlgmr.msrb.gmra.mxu0 %v2081_v12 }
 0x12a   :  { %898 = vmatpush.msrb.mxu2 %v586_v13  ;;  %960 = vmatpush.msrb.mxu0 %v724_v15  ;;  %v685_v13 = vld [vmem:[%s2420_s3 + $0x460] sm:$0xff]  ;;  %v682_v15 = vld [vmem:[%s2420_s3 + $0x448] sm:$0xff] }
 0x12c   :  { %899 = vmatpush.msrb.mxu2 %v583_v18  ;;  %961 = vmatpush.msrb.mxu0 %v721_v19  ;;  %v673_v18 = vld [vmem:[%s2420_s3 + $0x400] sm:$0xff]  ;;  %v670_v19 = vld [vmem:[%s2420_s3 + $0x3e8] sm:$0xff] }
 0x12d   :  { %832 = vmatmul.f32.vlgmr.msra.gmra.mxu2 %v2065_v3  ;;  %v478_v29 = vpop.f32.mrf.mxu3 }
 0x12e   :  { %900 = vmatpush.msrb.mxu2 %v580_v22  ;;  %962 = vmatpush.msrb.mxu0 %v718_v23  ;;  %v479_v30 = vadd.f32 %v478_v29, %v459_v25  ;;  %v658_v22 = vld [vmem:[%s2420_s3 + $0x388] sm:$0xff]  ;;  %v655_v23 = vld [vmem:[%s2420_s3 + $0x370] sm:$0xff]  ;;  %v649_v25 = vld [vmem:[%s2420_s3 + $0x340] sm:$0xff] }
 0x12f   :  { %v993_v29 = vld [vmem:[%s2421_s4 + $0x70] sm:$0xff] }
 0x130   :  { %901 = vmatpush.msrb.mxu2 %v577_v26  ;;  %963 = vmatpush.msrb.mxu0 %v715_v27  ;;  %v2127_v34 = vmax.f32 %v479_v30, 0.0  ;;  %v646_v26 = vld [vmem:[%s2420_s3 + $0x328] sm:$0xff]  ;;  %v643_v27 = vld [vmem:[%s2420_s3 + $0x310] sm:$0xff] }
 0x131   :  { %v992_v30 = vld [vmem:[%s2421_s4 + $0x68] sm:$0xff] }
 0x132   :  { %902 = vmatpush.msrb.mxu2 %v574_v31  ;;  %964 = vmatpush.msrb.mxu0 %v712_v32  ;;  %v1010_v31 = vld [vmem:[%s2421_s4 + $0xf8] sm:$0xff]  ;;  %v991_v32 = vld [vmem:[%s2421_s4 + $0x60] sm:$0xff] }
 0x133   :  { %792 = vmatmul.f32.vlgmr.msra.gmra.mxu1 %v2127_v34  ;;  %872 = vmatmul.f32.vlgmr.msra.gmra.mxu0 %v2127_v34 }
 0x134   :  { %903 = vmatpush.msrb.mxu2 %v571_v35  ;;  %916 = vmatpush.msra.mxu1 %v640_v36  ;;  %v988_v35 = vld [vmem:[%s2421_s4 + $0x48] sm:$0xff]  ;;  %v987_v36 = vld [vmem:[%s2421_s4 + $0x40] sm:$0xff] }
 0x135   :  { %965 = vmatpush.msrb.mxu0 %v709_v37  ;;  %v1009_v37 = vld [vmem:[%s2421_s4 + $0xf0] sm:$0xff] }
 0x136   :  { %904 = vmatpush.msrb.mxu2 %v568_v39  ;;  %917 = vmatpush.msra.mxu1 %v637_v40  ;;  %v1008_v39 = vld [vmem:[%s2421_s4 + $0xe8] sm:$0xff]  ;;  %v985_v40 = vld [vmem:[%s2421_s4 + $0x30] sm:$0xff] }
 0x137   :  { %966 = vmatpush.msrb.mxu0 %v706_v41  ;;  %v498_v1 = vpop.f32.mrf.mxu1  ;;  %v1007_v41 = vld [vmem:[%s2421_s4 + $0xe0] sm:$0xff] }
 0x138   :  { %905 = vmatpush.msrb.mxu2 %v565_v42  ;;  %918 = vmatpush.msra.mxu1 %v634_v43  ;;  %v499_v4 = vadd.f32 %v498_v1, %v293_v63  ;;  %v984_v42 = vld [vmem:[%s2421_s4 + $0x28] sm:$0xff]  ;;  %v1006_v43 = vld [vmem:[%s2421_s4 + $0xd8] sm:$0xff]  ;;  %v1015_v1 = vld [vmem:[%s2421_s4 + $0x120] sm:$0xff] }
 0x139   :  { %967 = vmatpush.msrb.mxu0 %v703_v44  ;;  %v983_v44 = vld [vmem:[%s2421_s4 + $0x20] sm:$0xff]  ;;  %v1016_v63 = vld [vmem:[%s2421_s4 + $0x128] sm:$0xff] }
 0x13a   :  { %906 = vmatpush.msrb.mxu2 %v562_v45  ;;  %919 = vmatpush.msra.mxu1 %v631_v46  ;;  %v1005_v45 = vld [vmem:[%s2421_s4 + $0xd0] sm:$0xff]  ;;  %v982_v46 = vld [vmem:[%s2421_s4 + $0x18] sm:$0xff] }
 0x13b   :  { %968 = vmatpush.msrb.mxu0 %v700_v14  ;;  %v1004_v14 = vld [vmem:[%s2421_s4 + $0xc8] sm:$0xff] }
 0x13c   :  { %907 = vmatpush.msrb.mxu2 %v559_v47  ;;  %920 = vmatpush.msra.mxu1 %v628_v49  ;;  %v981_v47 = vld [vmem:[%s2421_s4 + $0x10] sm:$0xff]  ;;  %v1003_v49 = vld [vmem:[%s2421_s4 + $0xc0] sm:$0xff] }
 0x13d   :  { %969 = vmatpush.msrb.mxu0 %v697_v50  ;;  %v980_v50 = vld [vmem:[%s2421_s4 + $0x8] sm:$0xff] }
 0x13e   :  { %908 = vmatpush.msrb.mxu2 %v556_v51  ;;  %921 = vmatpush.msra.mxu1 %v625_v52  ;;  %v1002_v51 = vld [vmem:[%s2421_s4 + $0xb8] sm:$0xff]  ;;  %v979_v52 = vld [vmem:[%s2421_s4] sm:$0xff] }
 0x13f   :  { %970 = vmatpush.msrb.mxu0 %v694_v53  ;;  %v1001_v53 = vld [vmem:[%s2421_s4 + $0xb0] sm:$0xff] }
 0x140   :  { %909 = vmatpush.msrb.mxu2 %v553_v54  ;;  %922 = vmatpush.msra.mxu1 %v622_v55  ;;  %v1000_v54 = vld [vmem:[%s2421_s4 + $0xa8] sm:$0xff]  ;;  %v999_v55 = vld [vmem:[%s2421_s4 + $0xa0] sm:$0xff] }
 0x141   :  { %971 = vmatpush.msrb.mxu0 %v691_v56  ;;  %v998_v56 = vld [vmem:[%s2421_s4 + $0x98] sm:$0xff] }
 0x142   :  { %910 = vmatpush.msrb.mxu2 %v550_v57  ;;  %923 = vmatpush.msra.mxu1 %v619_v58  ;;  %v997_v57 = vld [vmem:[%s2421_s4 + $0x90] sm:$0xff]  ;;  %v996_v58 = vld [vmem:[%s2421_s4 + $0x88] sm:$0xff] }
 0x143   :  { %1042 = vmatpush.msra.mxu0 %v1010_v31 }
 0x144   :  { %911 = vmatpush.msrb.mxu2 %v547_v59  ;;  %924 = vmatpush.msra.mxu1 %v616_v60  ;;  %v995_v59 = vld [vmem:[%s2421_s4 + $0x80] sm:$0xff]  ;;  %v1018_v60 = vld [vmem:[%s2421_s4 + $0x138] sm:$0xff] }
 0x145   :  { %912 = vmatmul.f32.vlgmr.msrb.gmra.mxu2 %v2065_v3  ;;  %v601_v3 = vld [vmem:[%s2420_s3 + $0x1c0] sm:$0xff]  ;;  %1043 = vmatpush.msra.mxu0 %v1009_v37 }
 0x146   :  { %925 = vmatpush.msra.mxu1 %v613_v61  ;;  %1022 = vmatpush.msra.mxu2 %v994_v28  ;;  %v1017_v61 = vld [vmem:[%s2421_s4 + $0x130] sm:$0xff] }
 0x147   :  { %1044 = vmatpush.msra.mxu0 %v1008_v39 }
 0x148   :  { %926 = vmatpush.msra.mxu1 %v610_v62  ;;  %1023 = vmatpush.msra.mxu2 %v993_v29  ;;  %v1095_v62 = vld [vmem:[%s2419_s5 + $0x2] ss:$8 sm:$0x7] }
 0x149   :  { %1045 = vmatpush.msra.mxu0 %v1007_v41 }
 0x14a   :  { %927 = vmatpush.msra.mxu1 %v607_v0  ;;  %1024 = vmatpush.msra.mxu2 %v992_v30  ;;  %v726_v0 = vperm.slane %v1095_v62, 0 }
 0x14b   :  { %1046 = vmatpush.msra.mxu0 %v1006_v43 }
 0x14c   :  { %928 = vmatpush.msra.mxu1 %v604_v2  ;;  %1025 = vmatpush.msra.mxu2 %v991_v32 }
 0x14d   :  { %v518_v5 = vpop.f32.mrf.mxu3  ;;  %1047 = vmatpush.msra.mxu0 %v1005_v45 }
 0x14e   :  { %v519_v6 = vadd.f32 %v518_v5, %v499_v4  ;;  %929 = vmatpush.msra.mxu1 %v601_v3  ;;  %1026 = vmatpush.msra.mxu2 %v990_v33 }
 0x14f   :  { %1048 = vmatpush.msra.mxu0 %v1004_v14 }
 0x150   :  { %v539_v8 = vadd.f32 %v538_v7, %v519_v6  ;;  %930 = vmatpush.msra.mxu1 %v598_v48  ;;  %v1014_v7 = vld [vmem:[%s2421_s4 + $0x118] sm:$0xff] }
 0x151   :  { %1049 = vmatpush.msra.mxu0 %v1003_v49 }
 0x152   :  { %v544_v10 = vmax.f32 %v539_v8, 0.0  ;;  %931 = vmatpush.msra.mxu1 %v595_v9 }
 0x153   :  { %1050 = vmatpush.msra.mxu0 %v1002_v51 }
 0x154   :  { %1103 = vmatmul.msk.f32.vlgmr.msrb.gmra.mxu3 %vm732_vm1, %v544_v10  ;;  %1104 = vmatmul.msk.f32.vlgmr.msrb.gmra.mxu1 %vm732_vm1, %v544_v10 }
 0x155   :  { %936 = vmatpush.msrb.mxu3 %v688_v11  ;;  %1105 = vmatmul.msk.f32.vlgmr.msrb.gmra.mxu0 %vm732_vm1, %v544_v10  ;;  %v1013_v10 = vld [vmem:[%s2421_s4 + $0x110] sm:$0xff]  ;;  %v727_v11 = vperm.slane %v1095_v62, 1 }
 0x156   :  { %1051 = vmatpush.msra.mxu0 %v1001_v53  ;;  %1070 = vmatpush.msrb.mxu1 %v1018_v60 }
 0x157   :  { %937 = vmatpush.msrb.mxu3 %v685_v13 }
 0x158   :  { %1052 = vmatpush.msra.mxu0 %v1000_v54  ;;  %1071 = vmatpush.msrb.mxu1 %v1017_v61 }
 0x159   :  { %938 = vmatpush.msrb.mxu3 %v682_v15  ;;  %v1012_v15 = vld [vmem:[%s2421_s4 + $0x108] sm:$0xff] }
 0x15a   :  { %1053 = vmatpush.msra.mxu0 %v999_v55  ;;  %1072 = vmatpush.msrb.mxu1 %v1016_v63 }
 0x15b   :  { %939 = vmatpush.msrb.mxu3 %v679_v16 }
 0x15c   :  { %852 = vmatmul.f32.vlgmr.msra.gmra.mxu3 %v2081_v12  ;;  %932 = vmatmul.f32.vlgmr.msra.gmra.mxu1 %v2081_v12  ;;  %v661_v12 = vld [vmem:[%s2420_s3 + $0x3a0] sm:$0xff] }
 0x15d   :  { %940 = vmatpush.msrb.mxu3 %v676_v17  ;;  %1054 = vmatpush.msra.mxu0 %v998_v56  ;;  %v1011_v17 = vld [vmem:[%s2421_s4 + $0x100] sm:$0xff] }
 0x15e   :  { %1073 = vmatpush.msrb.mxu1 %v1015_v1 }
 0x15f   :  { %941 = vmatpush.msrb.mxu3 %v673_v18  ;;  %1055 = vmatpush.msra.mxu0 %v997_v57 }
 0x160   :  { %1074 = vmatpush.msrb.mxu1 %v1014_v7 }
 0x161   :  { %942 = vmatpush.msrb.mxu3 %v670_v19  ;;  %1056 = vmatpush.msra.mxu0 %v996_v58 }
 0x162   :  { %1075 = vmatpush.msrb.mxu1 %v1013_v10 }
 0x163   :  { %943 = vmatpush.msrb.mxu3 %v667_v20  ;;  %1057 = vmatpush.msra.mxu0 %v995_v59 }
 0x164   :  { %1076 = vmatpush.msrb.mxu1 %v1012_v15 }
 0x165   :  { %944 = vmatpush.msrb.mxu3 %v664_v21 }
 0x166   :  { %1077 = vmatpush.msrb.mxu1 %v1011_v17 }
 0x167   :  { %945 = vmatpush.msrb.mxu3 %v661_v12 }
 0x169   :  { %946 = vmatpush.msrb.mxu3 %v658_v22 }
 0x16b   :  { %947 = vmatpush.msrb.mxu3 %v655_v23 }
 0x16d   :  { %948 = vmatpush.msrb.mxu3 %v652_v24 }
 0x16f   :  { %949 = vmatpush.msrb.mxu3 %v649_v25  ;;  %v728_v25 = vperm.slane %v1095_v62, 2 }
 0x171   :  { %950 = vmatpush.msrb.mxu3 %v646_v26 }
 0x173   :  { %951 = vmatpush.msrb.mxu3 %v643_v27 }
 0x174   :  { %952 = vmatmul.f32.vlgmr.msrb.gmra.mxu3 %v2127_v34  ;;  %v989_v34 = vld [vmem:[%s2421_s4 + $0x50] sm:$0xff] }
 0x175   :  { %1027 = vmatpush.msra.mxu2 %v989_v34 }
 0x177   :  { %1028 = vmatpush.msra.mxu2 %v988_v35  ;;  %v29_v35 = vld [vmem:[%s2419_s5 + $0x3] ss:$0 sm:$0xff] }
 0x179   :  { %1029 = vmatpush.msra.mxu2 %v987_v36 }
 0x17b   :  { %1030 = vmatpush.msra.mxu2 %v986_v38 }
 0x17d   :  { %1031 = vmatpush.msra.mxu2 %v985_v40 }
 0x17f   :  { %1032 = vmatpush.msra.mxu2 %v984_v42  ;;  %v30_v42 = vld [vmem:[%s2419_s5 + $0x4] ss:$0 sm:$0xff] }
 0x181   :  { %1033 = vmatpush.msra.mxu2 %v983_v44 }
 0x183   :  { %1034 = vmatpush.msra.mxu2 %v982_v46 }
 0x185   :  { %1035 = vmatpush.msra.mxu2 %v981_v47 }
 0x187   :  { %1036 = vmatpush.msra.mxu2 %v980_v50 }
 0x189   :  { %1037 = vmatpush.msra.mxu2 %v979_v52 }
 0x1a6   :  { %v773_v3 = vpop.f32.mrf.mxu0 }
 0x1a8   :  { %v753_v2 = vpop.f32.mrf.mxu2 }
 0x1a9   :  { %v754_v4 = vadd.f32 %v753_v2, %v726_v0 }
 0x1ab   :  { %v774_v6 = vadd.f32 %v773_v3, %v754_v4 }
 0x1b0   :  { %v793_v5 = vpop.f32.mrf.mxu1  ;;  %v833_v16 = vpop.f32.mrf.mxu2 }
 0x1b1   :  { %v794_v48 = vadd.f32 %v793_v5, %v774_v6  ;;  %v834_v18 = vadd.f32 %v833_v16, %v727_v11  ;;  %v873_v21 = vpop.f32.mrf.mxu0 }
 0x1c8   :  { %v913_v26 = vpop.f32.mrf.mxu2 }
 0x1c9   :  { %v914_v28 = vadd.f32 %v913_v26, %v728_v25 }
 0x1d1   :  { %v893_v22 = vpop.f32.mrf.mxu1 }
 0x1d2   :  { %v973_v32 = vpop.f32.mrf.mxu0 }
 0x1d7   :  { %v813_v8 = vpop.f32.mrf.mxu3 }
 0x1d8   :  { %v814_v9 = vadd.f32 %v813_v8, %v794_v48 }
 0x1d9   :  { %v933_v27 = vpop.f32.mrf.mxu1 }
 0x1da   :  { %v976_v13 = vmax.f32 %v814_v9, 0.0  ;;  %v934_v29 = vadd.f32 %v933_v27, %v914_v28 }
 0x1dc   :  { %1038 = vmatmul.f32.vlgmr.msra.gmra.mxu2 %v976_v13 }
 0x1df   :  { %v853_v19 = vpop.f32.mrf.mxu3 }
 0x1e0   :  { %v854_v20 = vadd.f32 %v853_v19, %v834_v18 }
 0x1e2   :  { %v874_v12 = vadd.f32 %v873_v21, %v854_v20 }
 0x1e4   :  { %v894_v23 = vadd.f32 %v893_v22, %v874_v12 }
 0x1e6   :  { %v977_v24 = vmax.f32 %v894_v23, 0.0 }
 0x1e8   :  { %1058 = vmatmul.f32.vlgmr.msra.gmra.mxu0 %v977_v24 }
 0x1f7   :  { %v953_v30 = vpop.f32.mrf.mxu3 }
 0x1f8   :  { %v954_v31 = vadd.f32 %v953_v30, %v934_v29 }
 0x1fa   :  { %v974_v33 = vadd.f32 %v973_v32, %v954_v31 }
 0x1fc   :  { %v978_v34 = vmax.f32 %v974_v33, 0.0 }
 0x1fe   :  { %1106 = vmatmul.msk.f32.vlgmr.msrb.gmra.mxu1 %vm62_vm0, %v978_v34 }
 0x25f   :  { %v1039_v36 = vpop.f32.mrf.mxu2 }
 0x260   :  { %v1040_v38 = vadd.f32 %v1039_v36, %v29_v35 }
 0x265   :  { %v1059_v37 = vpop.f32.mrf.mxu0 }
 0x266   :  { %v1060_v39 = vadd.f32 %v1059_v37, %v1040_v38 }
 0x27b   :  { %v1079_v40 = vpop.f32.mrf.mxu1 }
 0x27c   :  { %v1080_v41 = vadd.f32 %v1079_v40, %v1060_v39 }
 0x27e   :  { %v1082_v43 = vmax.f32 %v1080_v41, 0.0 }
 0x280   :  { %v1083_v44 = vmul.f32 %v1082_v43, %v30_v42 }
 0x282   :  { %v1085_v45 = vsel %vm1084_vm2, %v1083_v44, 0.0 }
 0x283   :  { %1086 = vadd.xlane.f32.xlu0 %v1085_v45 }
 0x2f6   :  { %v1087_v46 = vpop.xlane.xlu0 %1086 }
 0x2f7   :  { %1089 = vst.msk [vmem:[%s2422_s6] sm:$0x3] %vm1088_vm3, %v1087_v46 }

</bundles_post_ra>
